<compile_context>
chip_gen: v6e
topology: v6e:2x2x1
jax: 0.10.0
libtpu: 0.0.40
codegen_flags: <defaults>
</compile_context>

<pallas_src>
import jax
import jax.numpy as jnp
from jax.experimental import pallas as pl
from jax.experimental.pallas import tpu as pltpu

HIDDEN = 256
OUT_PAD = 128   # lane-dense padded output width (true Q-value is column 0)


def qnet_kernel(x_ref, a_ref,
                w1o_ref, w1a_ref, b1_ref,
                w2_ref, b2_ref,
                w3_ref, b3_ref,
                w4_ref, b4_ref,
                out_ref):
    """One batch tile of the fused 4-layer MLP.

    x/a and all weights are bf16; accumulation is f32 on the MXU.
    concat([x, a]) @ W1 is computed as x @ W1_obs + a @ W1_act (exact fusion).
    The final layer is padded to OUT_PAD zero columns so the store is
    lane-dense; the wrapper slices column 0.
    """
    x = x_ref[...]
    a = a_ref[...]

    h = (jnp.dot(x, w1o_ref[...], preferred_element_type=jnp.float32)
         + jnp.dot(a, w1a_ref[...], preferred_element_type=jnp.float32)
         + b1_ref[...])
    h = jnp.maximum(h, 0.0).astype(jnp.bfloat16)

    h = jnp.dot(h, w2_ref[...], preferred_element_type=jnp.float32) + b2_ref[...]
    h = jnp.maximum(h, 0.0).astype(jnp.bfloat16)

    h = jnp.dot(h, w3_ref[...], preferred_element_type=jnp.float32) + b3_ref[...]
    h = jnp.maximum(h, 0.0).astype(jnp.bfloat16)

    out = jnp.dot(h, w4_ref[...], preferred_element_type=jnp.float32) + b4_ref[...]
    out_ref[...] = out.astype(out_ref.dtype)


def _tile_b(B):
    # >=256 rows per tile on big batches (v6e/v7x MXU is 2x256); 128 minimum.
    if B >= 1024:
        return 512
    if B >= 256:
        return 256
    return 128


def qnetwork_forward(x, a, params):
    """x: [B, obs_dim], a: [B, n_actions] -> q: [B, 1] (float32)."""
    (w1o, w1a, b1, w2, b2, w3, b3, w4, b4) = params
    B, obs_dim = x.shape
    act_dim = a.shape[1]

    tb = _tile_b(B)
    B_pad = pl.cdiv(B, tb) * tb

    x = x.astype(jnp.bfloat16)
    a = a.astype(jnp.bfloat16)
    if B_pad != B:
        x = jnp.pad(x, ((0, B_pad - B), (0, 0)))
        a = jnp.pad(a, ((0, B_pad - B), (0, 0)))

    # Weights / biases stay resident in VMEM across the batch grid.
    def resident(arr):
        return pl.BlockSpec(arr.shape, lambda i: (0, 0))

    out = pl.pallas_call(
        qnet_kernel,
        out_shape=jax.ShapeDtypeStruct((B_pad, OUT_PAD), jnp.float32),
        grid=(B_pad // tb,),
        in_specs=[
            pl.BlockSpec((tb, obs_dim), lambda i: (i, 0)),   # x tile
            pl.BlockSpec((tb, act_dim), lambda i: (i, 0)),   # a tile
            resident(w1o), resident(w1a), resident(b1),
            resident(w2), resident(b2),
            resident(w3), resident(b3),
            resident(w4), resident(b4),
        ],
        out_specs=pl.BlockSpec((tb, OUT_PAD), lambda i: (i, 0)),
        compiler_params=pltpu.CompilerParams(
            dimension_semantics=("parallel",)),   # v7x: shard batch over 2 TCs
    )(x, a, w1o, w1a, b1, w2, b2, w3, b3, w4, b4)

    return out[:B, :1]


def init_params(key, obs_dim, n_actions, hidden=HIDDEN):
    """nn.Linear-style init. Weights stored pre-transposed [in, out] in bf16,
    biases in f32. W1 is split into obs/action parts (fused concat) and the
    final layer is zero-padded to OUT_PAD output columns (lane-dense store)."""
    in_dim = obs_dim + n_actions

    def linear(k, fan_in, fan_out):
        kw, kb = jax.random.split(k)
        bound = 1.0 / jnp.sqrt(jnp.float32(fan_in))
        w = jax.random.uniform(kw, (fan_in, fan_out), jnp.float32, -bound, bound)
        b = jax.random.uniform(kb, (1, fan_out), jnp.float32, -bound, bound)
        return w, b

    k1, k2, k3, k4 = jax.random.split(key, 4)
    w1, b1 = linear(k1, in_dim, hidden)   # fan_in = obs + act, matches nn.Linear
    w2, b2 = linear(k2, hidden, hidden)
    w3, b3 = linear(k3, hidden, hidden)
    w4, b4 = linear(k4, hidden, 1)

    w1o, w1a = w1[:obs_dim], w1[obs_dim:]
    w4p = jnp.zeros((hidden, OUT_PAD), jnp.float32).at[:, :1].set(w4)
    b4p = jnp.zeros((1, OUT_PAD), jnp.float32).at[:, :1].set(b4)

    bf = lambda w: w.astype(jnp.bfloat16)
    return (bf(w1o), bf(w1a), b1,
            bf(w2), b2,
            bf(w3), b3,
            bf(w4p), b4p)


def reference_forward(x, a, params):
    """Plain-JAX reference with the same numerics (bf16 operands, f32 accum)."""
    (w1o, w1a, b1, w2, b2, w3, b3, w4, b4) = params

    def dot(p, q):
        return jnp.dot(p.astype(jnp.bfloat16), q, preferred_element_type=jnp.float32)

    h = dot(x, w1o) + dot(a, w1a) + b1
    h = jnp.maximum(h, 0.0)
    h = dot(h, w2) + b2
    h = jnp.maximum(h, 0.0)
    h = dot(h, w3) + b3
    h = jnp.maximum(h, 0.0)
    out = dot(h, w4) + b4
    return out[:, :1]


if __name__ == "__main__":
    key = jax.random.PRNGKey(0)
    k_x, k_a, k_p = jax.random.split(key, 3)

    batch = 200       # exercises batch padding (-> 256) and a 2-step grid
    obs_dim = 16      # np.array(env.observation_space.shape).prod()
    n_actions = 4

    x = jax.random.normal(k_x, (batch, obs_dim), jnp.float32)
    a = jax.random.normal(k_a, (batch, n_actions), jnp.float32)
    params = init_params(k_p, obs_dim, n_actions)

    q = qnetwork_forward(x, a, params)
    q = jax.block_until_ready(q)

    q_ref = reference_forward(x, a, params)
    assert q.shape == (batch, 1)
    assert jnp.allclose(q, q_ref, atol=2e-2, rtol=2e-2), "mismatch vs JAX reference"

    print("KERNEL_OK")
</pallas_src>

<mosaic_0001>
module attributes {stable_mosaic.version = 11 : i64} {
  func.func @qnet_kernel(%arg0: i32, %arg1: memref<128x16xbf16, #tpu.memory_space<vmem>>, %arg2: memref<128x4xbf16, #tpu.memory_space<vmem>>, %arg3: memref<16x256xbf16, #tpu.memory_space<vmem>>, %arg4: memref<4x256xbf16, #tpu.memory_space<vmem>>, %arg5: memref<1x256xf32, #tpu.memory_space<vmem>>, %arg6: memref<256x256xbf16, #tpu.memory_space<vmem>>, %arg7: memref<1x256xf32, #tpu.memory_space<vmem>>, %arg8: memref<256x256xbf16, #tpu.memory_space<vmem>>, %arg9: memref<1x256xf32, #tpu.memory_space<vmem>>, %arg10: memref<256x128xbf16, #tpu.memory_space<vmem>>, %arg11: memref<1x128xf32, #tpu.memory_space<vmem>>, %arg12: memref<128x128xf32, #tpu.memory_space<vmem>>) attributes {dimension_semantics = [#tpu.dimension_semantics<parallel>], iteration_bounds = array<i64: 2>, scalar_prefetch = 0 : i64, scratch_operands = 0 : i64, tpu.core_type = #tpu.core_type<tc>, window_params = [{transform_indices = @transform_0, window_bounds = array<i64: 128, 16>}, {transform_indices = @transform_1, window_bounds = array<i64: 128, 4>}, {pipeline_mode = #tpu.pipeline_mode<synchronous>, transform_indices = @transform_2, window_bounds = array<i64: 16, 256>}, {pipeline_mode = #tpu.pipeline_mode<synchronous>, transform_indices = @transform_3, window_bounds = array<i64: 4, 256>}, {pipeline_mode = #tpu.pipeline_mode<synchronous>, transform_indices = @transform_4, window_bounds = array<i64: 1, 256>}, {pipeline_mode = #tpu.pipeline_mode<synchronous>, transform_indices = @transform_5, window_bounds = array<i64: 256, 256>}, {pipeline_mode = #tpu.pipeline_mode<synchronous>, transform_indices = @transform_6, window_bounds = array<i64: 1, 256>}, {pipeline_mode = #tpu.pipeline_mode<synchronous>, transform_indices = @transform_7, window_bounds = array<i64: 256, 256>}, {pipeline_mode = #tpu.pipeline_mode<synchronous>, transform_indices = @transform_8, window_bounds = array<i64: 1, 256>}, {pipeline_mode = #tpu.pipeline_mode<synchronous>, transform_indices = @transform_9, window_bounds = array<i64: 256, 128>}, {pipeline_mode = #tpu.pipeline_mode<synchronous>, transform_indices = @transform_10, window_bounds = array<i64: 1, 128>}, {transform_indices = @transform_11, window_bounds = array<i64: 128, 128>}]} {
    %c0 = arith.constant 0 : index
    %c0_0 = arith.constant 0 : index
    %0 = vector.load %arg1[%c0, %c0_0] : memref<128x16xbf16, #tpu.memory_space<vmem>>, vector<128x16xbf16>
    %c0_1 = arith.constant 0 : index
    %c0_2 = arith.constant 0 : index
    %1 = vector.load %arg2[%c0_1, %c0_2] : memref<128x4xbf16, #tpu.memory_space<vmem>>, vector<128x4xbf16>
    %c0_3 = arith.constant 0 : index
    %c0_4 = arith.constant 0 : index
    %2 = vector.load %arg3[%c0_3, %c0_4] : memref<16x256xbf16, #tpu.memory_space<vmem>>, vector<16x256xbf16>
    %cst = arith.constant dense<0.000000e+00> : vector<128x256xf32>
    %3 = tpu.matmul %0, %2, %cst {dimension_numbers = #tpu.dot_dimension_numbers<[1], [0], [0], [1], [0, 0, 1, 1], [], []>} : vector<128x16xbf16>, vector<16x256xbf16>, vector<128x256xf32> -> vector<128x256xf32>
    %c0_5 = arith.constant 0 : index
    %c0_6 = arith.constant 0 : index
    %4 = vector.load %arg4[%c0_5, %c0_6] : memref<4x256xbf16, #tpu.memory_space<vmem>>, vector<4x256xbf16>
    %cst_7 = arith.constant dense<0.000000e+00> : vector<128x256xf32>
    %5 = tpu.matmul %1, %4, %cst_7 {dimension_numbers = #tpu.dot_dimension_numbers<[1], [0], [0], [1], [0, 0, 1, 1], [], []>} : vector<128x4xbf16>, vector<4x256xbf16>, vector<128x256xf32> -> vector<128x256xf32>
    %6 = arith.addf %3, %5 : vector<128x256xf32>
    %c0_8 = arith.constant 0 : index
    %c0_9 = arith.constant 0 : index
    %7 = vector.load %arg5[%c0_8, %c0_9] : memref<1x256xf32, #tpu.memory_space<vmem>>, vector<1x256xf32>
    %8 = vector.broadcast %7 : vector<1x256xf32> to vector<128x256xf32>
    %9 = arith.addf %6, %8 : vector<128x256xf32>
    %cst_10 = arith.constant 0.000000e+00 : f32
    %10 = vector.broadcast %cst_10 : f32 to vector<128x256xf32>
    %11 = arith.maximumf %9, %10 : vector<128x256xf32>
    %12 = arith.truncf %11 : vector<128x256xf32> to vector<128x256xbf16>
    %c0_11 = arith.constant 0 : index
    %c0_12 = arith.constant 0 : index
    %13 = vector.load %arg6[%c0_11, %c0_12] : memref<256x256xbf16, #tpu.memory_space<vmem>>, vector<256x256xbf16>
    %cst_13 = arith.constant dense<0.000000e+00> : vector<128x256xf32>
    %14 = tpu.matmul %12, %13, %cst_13 {dimension_numbers = #tpu.dot_dimension_numbers<[1], [0], [0], [1], [0, 0, 1, 1], [], []>} : vector<128x256xbf16>, vector<256x256xbf16>, vector<128x256xf32> -> vector<128x256xf32>
    %c0_14 = arith.constant 0 : index
    %c0_15 = arith.constant 0 : index
    %15 = vector.load %arg7[%c0_14, %c0_15] : memref<1x256xf32, #tpu.memory_space<vmem>>, vector<1x256xf32>
    %16 = vector.broadcast %15 : vector<1x256xf32> to vector<128x256xf32>
    %17 = arith.addf %14, %16 : vector<128x256xf32>
    %cst_16 = arith.constant 0.000000e+00 : f32
    %18 = vector.broadcast %cst_16 : f32 to vector<128x256xf32>
    %19 = arith.maximumf %17, %18 : vector<128x256xf32>
    %20 = arith.truncf %19 : vector<128x256xf32> to vector<128x256xbf16>
    %c0_17 = arith.constant 0 : index
    %c0_18 = arith.constant 0 : index
    %21 = vector.load %arg8[%c0_17, %c0_18] : memref<256x256xbf16, #tpu.memory_space<vmem>>, vector<256x256xbf16>
    %cst_19 = arith.constant dense<0.000000e+00> : vector<128x256xf32>
    %22 = tpu.matmul %20, %21, %cst_19 {dimension_numbers = #tpu.dot_dimension_numbers<[1], [0], [0], [1], [0, 0, 1, 1], [], []>} : vector<128x256xbf16>, vector<256x256xbf16>, vector<128x256xf32> -> vector<128x256xf32>
    %c0_20 = arith.constant 0 : index
    %c0_21 = arith.constant 0 : index
    %23 = vector.load %arg9[%c0_20, %c0_21] : memref<1x256xf32, #tpu.memory_space<vmem>>, vector<1x256xf32>
    %24 = vector.broadcast %23 : vector<1x256xf32> to vector<128x256xf32>
    %25 = arith.addf %22, %24 : vector<128x256xf32>
    %cst_22 = arith.constant 0.000000e+00 : f32
    %26 = vector.broadcast %cst_22 : f32 to vector<128x256xf32>
    %27 = arith.maximumf %25, %26 : vector<128x256xf32>
    %28 = arith.truncf %27 : vector<128x256xf32> to vector<128x256xbf16>
    %c0_23 = arith.constant 0 : index
    %c0_24 = arith.constant 0 : index
    %29 = vector.load %arg10[%c0_23, %c0_24] : memref<256x128xbf16, #tpu.memory_space<vmem>>, vector<256x128xbf16>
    %cst_25 = arith.constant dense<0.000000e+00> : vector<128x128xf32>
    %30 = tpu.matmul %28, %29, %cst_25 {dimension_numbers = #tpu.dot_dimension_numbers<[1], [0], [0], [1], [0, 0, 1, 1], [], []>} : vector<128x256xbf16>, vector<256x128xbf16>, vector<128x128xf32> -> vector<128x128xf32>
    %c0_26 = arith.constant 0 : index
    %c0_27 = arith.constant 0 : index
    %31 = vector.load %arg11[%c0_26, %c0_27] : memref<1x128xf32, #tpu.memory_space<vmem>>, vector<1x128xf32>
    %32 = vector.broadcast %31 : vector<1x128xf32> to vector<128x128xf32>
    %33 = arith.addf %30, %32 : vector<128x128xf32>
    %c0_28 = arith.constant 0 : index
    %c0_29 = arith.constant 0 : index
    %34 = vector.load %arg12[%c0_28, %c0_29] : memref<128x128xf32, #tpu.memory_space<vmem>>, vector<128x128xf32>
    tpu.vector_store %arg12[%c0_28, %c0_29], %33 {strides = array<i32>} : memref<128x128xf32, #tpu.memory_space<vmem>>, vector<128x128xf32>,
    return
  }
  func.func @transform_0(%arg0: i32) -> (i32, i32) {
    %c0_i32 = arith.constant 0 : i32
    %c0_i32_0 = arith.constant 0 : i32
    return %arg0, %c0_i32 : i32, i32
  }
  func.func @transform_1(%arg0: i32) -> (i32, i32) {
    %c0_i32 = arith.constant 0 : i32
    %c0_i32_0 = arith.constant 0 : i32
    return %arg0, %c0_i32 : i32, i32
  }
  func.func @transform_2(%arg0: i32) -> (i32, i32) {
    %c0_i32 = arith.constant 0 : i32
    %c0_i32_0 = arith.constant 0 : i32
    %c0_i32_1 = arith.constant 0 : i32
    return %c0_i32, %c0_i32_0 : i32, i32
  }
  func.func @transform_3(%arg0: i32) -> (i32, i32) {
    %c0_i32 = arith.constant 0 : i32
    %c0_i32_0 = arith.constant 0 : i32
    %c0_i32_1 = arith.constant 0 : i32
    return %c0_i32, %c0_i32_0 : i32, i32
  }
  func.func @transform_4(%arg0: i32) -> (i32, i32) {
    %c0_i32 = arith.constant 0 : i32
    %c0_i32_0 = arith.constant 0 : i32
    %c0_i32_1 = arith.constant 0 : i32
    return %c0_i32, %c0_i32_0 : i32, i32
  }
  func.func @transform_5(%arg0: i32) -> (i32, i32) {
    %c0_i32 = arith.constant 0 : i32
    %c0_i32_0 = arith.constant 0 : i32
    %c0_i32_1 = arith.constant 0 : i32
    return %c0_i32, %c0_i32_0 : i32, i32
  }
  func.func @transform_6(%arg0: i32) -> (i32, i32) {
    %c0_i32 = arith.constant 0 : i32
    %c0_i32_0 = arith.constant 0 : i32
    %c0_i32_1 = arith.constant 0 : i32
    return %c0_i32, %c0_i32_0 : i32, i32
  }
  func.func @transform_7(%arg0: i32) -> (i32, i32) {
    %c0_i32 = arith.constant 0 : i32
    %c0_i32_0 = arith.constant 0 : i32
    %c0_i32_1 = arith.constant 0 : i32
    return %c0_i32, %c0_i32_0 : i32, i32
  }
  func.func @transform_8(%arg0: i32) -> (i32, i32) {
    %c0_i32 = arith.constant 0 : i32
    %c0_i32_0 = arith.constant 0 : i32
    %c0_i32_1 = arith.constant 0 : i32
    return %c0_i32, %c0_i32_0 : i32, i32
  }
  func.func @transform_9(%arg0: i32) -> (i32, i32) {
    %c0_i32 = arith.constant 0 : i32
    %c0_i32_0 = arith.constant 0 : i32
    %c0_i32_1 = arith.constant 0 : i32
    return %c0_i32, %c0_i32_0 : i32, i32
  }
  func.func @transform_10(%arg0: i32) -> (i32, i32) {
    %c0_i32 = arith.constant 0 : i32
    %c0_i32_0 = arith.constant 0 : i32
    %c0_i32_1 = arith.constant 0 : i32
    return %c0_i32, %c0_i32_0 : i32, i32
  }
  func.func @transform_11(%arg0: i32) -> (i32, i32) {
    %c0_i32 = arith.constant 0 : i32
    %c0_i32_0 = arith.constant 0 : i32
    return %arg0, %c0_i32 : i32, i32
  }
}

</mosaic_0001>

<bundles_post_ra>
// kernel: tpu_custom_call.1
= control target key start
LH: loop header
LB: loop body
LE: loop exit
PB: predicated region body
PF: predicated region fallthrough
CT: control target
= control target key end

     0   :  { %16 = vsyncpa [#allocation3], 0  ;;  %s3129_s0 = inlined_call_operand.vmem [shape: bf16[256,16], index: 0, kind: input, shape index: {}]   ;;  %s3130_s1 = inlined_call_operand.vmem [shape: bf16[256,4], index: 1, kind: input, shape index: {}]   ;;  %s3131_s2 = inlined_call_operand.vmem [shape: bf16[16,256], index: 2, kind: input, shape index: {}]   ;;  %s3132_s3 = inlined_call_operand.vmem [shape: bf16[4,256], index: 3, kind: input, shape index: {}]   ;;  %s3133_s4 = inlined_call_operand.vmem [shape: f32[1,256], index: 4, kind: input, shape index: {}]   ;;  %s3134_s5 = inlined_call_operand.vmem [shape: bf16[256,256], index: 5, kind: input, shape index: {}]   ;;  %s3135_s6 = inlined_call_operand.vmem [shape: f32[1,256], index: 6, kind: input, shape index: {}]   ;;  %s3136_s7 = inlined_call_operand.hbm [shape: bf16[256,256], index: 7, kind: input, shape index: {}]   ;;  %s3137_s8 = inlined_call_operand.vmem [shape: f32[1,256], index: 8, kind: input, shape index: {}]   ;;  %s3138_s9 = inlined_call_operand.hbm [shape: bf16[256,128], index: 9, kind: input, shape index: {}]   ;;  %s3139_s10 = inlined_call_operand.vmem [shape: f32[1,128], index: 10, kind: input, shape index: {}]   ;;  %s3140_s11 = inlined_call_operand.hbm [shape: f32[256,128], index: 11, kind: output, shape index: {}]  }
   0x1   :  { %17 = vsyncpa [#allocation6], 0 }
   0x2   :  { %18 = vsyncpa [#allocation4], 0 }
   0x3   :  { %20 = vsyncpa [#allocation4 + $0x1], 0  ;;  %s2644_s17 = smov 0   ;;  %s2646_s18 = smov 0  }
   0x4   :  { %s2648_s19 = smov 0   ;;  %s2650_s20 = smov 0  }
   0x5 LB: > { %3145 = sst [smem:[#allocation11_spill]] %s2568_s19  ;;  %s2665_s21 = sadd.s32 4294967295, %s2572_s20   ;;  %s2572_s20 = sphi %s2650_s20, %s3157_s20   ;;  %s2568_s19 = sphi %s2648_s19, %s3159_s19   ;;  %s2564_s18 = sphi %s2646_s18, %s3161_s18   ;;  %s2560_s17 = sphi %s2644_s17, %s3160_s17  }
   0x6   : > { %s2038_s22 = sadd.s32 4294967294, %s2572_s20   ;;  %s2669_s23 = sadd.s32 1, %s2572_s20  }
   0x7   : > { %3146 = sst [smem:[#allocation12_spill]] %s2669_s23  ;;  %s274_s24 = sadd.s32 1, %s2568_s19 }
   0x8   : > { %s271_s25 = ssub.s32 %s2572_s20, %s2669_s23  ;;  %p284_p0 = scmp.ne.s32.totalorder %s2568_s19, %s2564_s18 }
   0x9   : > { %p272_p1 = scmp.eq.s32.totalorder %s271_s25, 0  ;;  %p285_p2 = scmp.eq.s32.totalorder %s2665_s21, 1 }
   0xa   : > { %p290_p3 = scmp.ne.s32.totalorder %s2564_s18, %s2560_s17  ;;  %p291_p4 = scmp.eq.s32.totalorder %s2038_s22, 1 }
   0xb   : > { %s2680_s26 = scalar_select %p272_p1, %s2568_s19, %s274_s24  }
   0xc   : > { %p2682_p5 = por %p285_p2, %p284_p0  ;;  %p2686_p6 = por %p291_p4, %p290_p3 }
   0xd   : > { %3147 = sst [smem:[#allocation13_spill]] %s2680_s26  ;;  %p2039_p7 = scmp.ge.s32.totalorder %s2572_s20, 1 }
   0xe   : > { %s3149_s28 = scalar_select %p2686_p6, 1, 0 }
   0xf   : > { %p298_p8 = scmp.lt.s32.totalorder %s2572_s20, 3  ;;  %p3141_p9 = scmp.eq.s32.totalorder %s2665_s21, 0 }
  0x10   : > { %s2574_s30 = smov [#allocation2]   ;;  %s2575_s14 = smov [#allocation5]  }
  0x11   : > { %p2693_p10 = pnand %p2039_p7, %p298_p8  ;;  %s325_s12 = sshll.u32 %s2574_s30, 4  ;;  %s326_s12 = int_to_ptr.vmem [resolvable:$true] %s325_s12 }
  0x12   : > { %s341_s15 = sshll.u32 %s2575_s14, 4  ;;  %s2463_s16 = scalar_lea.vmem %s326_s12, 4096  ;;  %s342_s15 = int_to_ptr.vmem [resolvable:$true] %s341_s15 }
  0x13   : > { %p2264_p11 = pneg %p2693_p10  ;;  %p2464_p0 = scmp.ne.s32.totalorder %s326_s12, %s2463_s16 }
  0x14   : > { %p2471_p3 = scmp.lt.s32.totalorder %s326_s12, %s326_s12  ;;  %p2472_p4 = scmp.lt.s32.totalorder %s2463_s16, %s2463_s16 }
  0x15   : > { %p2701_p12 = pnand %p3141_p9, %p2264_p11 }
  0x16   : > { %p2473_p7 = por %p2472_p4, %p2471_p3 }
  0x17   : > { %p2454_p13 = pneg %p2701_p12 }
  0x19   : > { %p2466_p1 = pnand %p2464_p0, %p2454_p13 }
  0x1b   : > { %p2467_p2 = pneg %p2466_p1 }
  0x1d   : > { %p2474_p8 = pnand %p2473_p7, %p2467_p2 }
  0x1f   : > { %2477 = shalt.err (!%p2474_p8)
}
  0x20   : > { %s2576_s22 = smov 128   ;;  %s2577_s24 = smov 8  }
  0x21   : > { %2267 = dma.hbm_to_vmem [thread:$0]  (!%p2701_p12), %s3136_s7, 4096, %s326_s12, [#allocation3], %s2576_s22, %s2576_s22, %s2577_s24  }
  0x22   : > { %s2489_s14 = scalar_lea.vmem %s342_s15, 2048  ;;  %p2497_p9 = scmp.lt.s32.totalorder %s342_s15, %s342_s15 }
  0x23   : > { %p2490_p11 = scmp.ne.s32.totalorder %s342_s15, %s2489_s14  ;;  %p2498_p6 = scmp.lt.s32.totalorder %s2489_s14, %s2489_s14 }
  0x25   : > { %p2492_p0 = pnand %p2490_p11, %p2454_p13  ;;  %p2499_p3 = por %p2498_p6, %p2497_p9 }
  0x27   : > { %p2493_p1 = pneg %p2492_p0 }
  0x29   : > { %p2500_p2 = pnand %p2499_p3, %p2493_p1 }
  0x2b   : > { %2503 = shalt.err (!%p2500_p2)
}
  0x2c   : > { %s2578_s16 = smov 64   ;;  %s2579_s26 = smov 4  }
  0x2d   : > { %2270 = dma.hbm_to_vmem [thread:$0]  (!%p2701_p12), %s3138_s9, 2048, %s342_s15, [#allocation6], %s2578_s16, %s2578_s16, %s2579_s26  }
  0x2e   : > { %378 = sbr.rel (%p2693_p10) target bundleno = 957 (0x3bd), region = 64  ;;  %p3152_p4 = scmp.eq.s32.totalorder (!%p2693_p10), %s2665_s21, 0 }
  0x33   : > { %2547 = dma.done.wait (%p3152_p4), [#allocation3], 4096   ;;  %p3153_p13 = pmov %p3152_p4 }
  0x34   : > { %p3154_p6 = pmov %p3152_p4 }
  0x35   : > { %2549 = vsyncadd (%p3153_p13), [#allocation3], 4294963200 }
  0x36   : > { %2551 = dma.done.wait (%p3154_p6), [#allocation6], 2048   ;;  %p3155_p9 = pmov %p3152_p4 }
  0x37   : > { %s2047_s12 = sshll.u32 %s2665_s21, 4  ;;  %v2580_v0 = vmov 0   ;;  %vm550_vm0 = vcmask 1041408   ;;  %v2321_v3 = vld [vmem:[%s3131_s2 + $0x4] ss:$8 sps:$4 sm:$0xff]   ;;  %vm525_vm1 = vcmask 31744  }
  0x38   : > { %2553 = vsyncadd (%p3155_p9), [#allocation6], 4294965248  ;;  %589 = vmatprep.mubr.bf16.mxu0 %v2580_v0  ;;  %777 = vmatprep.mubr.bf16.mxu1 %v2580_v0  ;;  %p428_p10 = scmp.lt.s32.totalorder %s2047_s12, 31  ;;  %v2323_v5 = vld [vmem:[%s3131_s2] ss:$8 sps:$4 sm:$0xff]   ;;  %vm720_vm2 = vcmask 130048  }
  0x39   : > { %v2059_v1 = vld.sshfl [vmem:[%s3132_s3] sm:$0x33 pattern:$0x76325410]  ;;  %759 = vmatprep.subr.bf16.mxu1 %v2321_v3  ;;  %v2340_v11 = vld [vmem:[%s3134_s5 + $0x70] ss:$8 sps:$4 sm:$0xff]  }
  0x3a   : > { %s3163_s12 = smov (!%p428_p10, %s2047_s12), 31  ;;  %v524_v2 = vcombine.high %v2059_v1, %v2059_v1  ;;  %v552_v4 = vsel %vm550_vm0, %v2059_v1, 0  ;;  %760 = vmatpush1.bf16.msra.mxu1 %v2323_v5  ;;  %v2342_v12 = vld [vmem:[%s3134_s5 + $0x74] ss:$8 sps:$4 sm:$0xff]   ;;  %v2345_v14 = vld [vmem:[%s3134_s5 + $0x64] ss:$8 sps:$4 sm:$0xff]  }
  0x3b   : > { %s2048_s19 = sshll.u32 %s3163_s12, 2  ;;  %v2343_v15 = vld [vmem:[%s3134_s5 + $0x60] ss:$8 sps:$4 sm:$0xff]   ;;  %v2348_v16 = vld [vmem:[%s3134_s5 + $0x54] ss:$8 sps:$4 sm:$0xff]   ;;  %s2173_s22 = sshll.u32 %s2665_s21, 11 }
  0x3c   : > { %s2739_s29 = scalar_lea.vmem %s3130_s1, %s2048_s19  ;;  %s2747_s25 = scalar_lea.vmem %s3129_s0, %s2048_s19  ;;  %2060 = vmatprep.subr.msk.bf16.mxu0 %vm550_vm0, %v524_v2  ;;  %v2346_v17 = vld [vmem:[%s3134_s5 + $0x50] ss:$8 sps:$4 sm:$0xff]   ;;  %v2351_v19 = vld [vmem:[%s3134_s5 + $0x44] ss:$8 sps:$4 sm:$0xff]   ;;  %v2349_v21 = vld [vmem:[%s3134_s5 + $0x40] ss:$8 sps:$4 sm:$0xff]  }
  0x3d   : > { %v2324_v6 = vld [vmem:[%s2739_s29] sm:$0xff]   ;;  %572 = vmatpush1.bf16.msra.mxu0 %v552_v4  ;;  %v2326_v8 = vld [vmem:[%s2739_s29 + $0x8] sm:$0xff]   ;;  %v2328_v10 = vld [vmem:[%s2739_s29 + $0x10] sm:$0xff]   ;;  %s424_s19 = sand.u32 1, %s2564_s18   ;;  %s2581_s16 = smov [#allocation7]  }
  0x3e   : > { %v2325_v7 = vld [vmem:[%s2747_s25] sm:$0xff]   ;;  %v2327_v9 = vld [vmem:[%s2747_s25 + $0x8] sm:$0xff]   ;;  %v2329_v13 = vld [vmem:[%s2747_s25 + $0x10] sm:$0xff]   ;;  %1154 = vmatprep.subr.bf16.mxu0 %v2342_v12  ;;  %s2046_s23 = sshll.u32 %s424_s19, 7  ;;  %s3089_s14 = scalar_lea.sflag [#allocation4], %s424_s19 }
  0x3f   : > { %2079 = vmatmul.mubr.msk.bf16.vlgmr.msra.gmra.mxu1 %vm720_vm2, %v2325_v7  ;;  %v2330_v18 = vld [vmem:[%s2739_s29 + $0x18] sm:$0xff]   ;;  %v2332_v23 = vld [vmem:[%s2739_s29 + $0x20] sm:$0xff]   ;;  %v2334_v31 = vld [vmem:[%s2739_s29 + $0x28] sm:$0xff]   ;;  %s3045_s15 = scalar_lea.vmem [#allocation7], %s2046_s23  ;;  %s2508_s12 = sshll.u32 %s2581_s16, 4  ;;  %s2509_s12 = int_to_ptr.vmem [resolvable:$false] %s2508_s12 }
  0x40   : > { %2061 = vmatmul.mubr.msk.bf16.vlgmr.msra.gmra.mxu0 %vm525_vm1, %v2324_v6  ;;  %787 = vmatprep.mubr.bf16.mxu1 %v2580_v0  ;;  %v2331_v20 = vld [vmem:[%s2747_s25 + $0x18] sm:$0xff]   ;;  %v2333_v25 = vld [vmem:[%s2747_s25 + $0x20] sm:$0xff]   ;;  %v2335_v32 = vld [vmem:[%s2747_s25 + $0x28] sm:$0xff]   ;;  %s1942_s24 = sshll.u32 %s3045_s15, 4  ;;  %s2510_s23 = scalar_lea.vmem %s2509_s12, 4096  ;;  %s3083_s24 = int_to_ptr.vmem [resolvable:$true] %s1942_s24 }
  0x41   : > { %599 = vmatprep.mubr.bf16.mxu0 %v2580_v0  ;;  %1155 = vmatpush1.bf16.msra.mxu0 %v2340_v11  ;;  %v2354_v22 = vld [vmem:[%s3134_s5 + $0x34] ss:$8 sps:$4 sm:$0xff]   ;;  %v2352_v24 = vld [vmem:[%s3134_s5 + $0x30] ss:$8 sps:$4 sm:$0xff]   ;;  %v2357_v26 = vld [vmem:[%s3134_s5 + $0x24] ss:$8 sps:$4 sm:$0xff]   ;;  %p2511_p11 = scmp.lt.s32.totalorder %s3083_s24, %s2509_s12 }
  0x42   : > { %1156 = vmatprep.subr.bf16.mxu0 %v2345_v14  ;;  %v2355_v27 = vld [vmem:[%s3134_s5 + $0x20] ss:$8 sps:$4 sm:$0xff]   ;;  %v2360_v28 = vld [vmem:[%s3134_s5 + $0x14] ss:$8 sps:$4 sm:$0xff]   ;;  %v2358_v29 = vld [vmem:[%s3134_s5 + $0x10] ss:$8 sps:$4 sm:$0xff]  }
  0x43   : > { %v2363_v30 = vld [vmem:[%s3134_s5 + $0x4] ss:$8 sps:$4 sm:$0xff]   ;;  %v2361_v33 = vld [vmem:[%s3134_s5] ss:$8 sps:$4 sm:$0xff]   ;;  %v2366_v34 = vld [vmem:[%s3134_s5 + $0xf4] ss:$8 sps:$4 sm:$0xff]  }
  0x44   : > { %v2364_v35 = vld [vmem:[%s3134_s5 + $0xf0] ss:$8 sps:$4 sm:$0xff]   ;;  %v2369_v36 = vld [vmem:[%s3134_s5 + $0xe4] ss:$8 sps:$4 sm:$0xff]   ;;  %v2367_v39 = vld [vmem:[%s3134_s5 + $0xe0] ss:$8 sps:$4 sm:$0xff]  }
  0x45   : > { %1157 = vmatpush1.bf16.msra.mxu0 %v2343_v15  ;;  %v2336_v37 = vld [vmem:[%s2739_s29 + $0x30] sm:$0xff]   ;;  %v2375_v42 = vld [vmem:[%s3134_s5 + $0xc4] ss:$8 sps:$4 sm:$0xff]   ;;  %v2338_v43 = vld [vmem:[%s2739_s29 + $0x38] sm:$0xff]   ;;  %s2504_s21 = scalar_lea.vmem %s3083_s24, 2048 }
  0x46   : > { %1158 = vmatprep.subr.bf16.mxu0 %v2348_v16  ;;  %v2337_v38 = vld [vmem:[%s2747_s25 + $0x30] sm:$0xff]   ;;  %v2339_v44 = vld [vmem:[%s2747_s25 + $0x38] sm:$0xff]   ;;  %v2373_v45 = vld [vmem:[%s3134_s5 + $0xc0] ss:$8 sps:$4 sm:$0xff]   ;;  %v860_v16 = vlaneseq  ;;  %s3081_s25 = scalar_lea.hbm %s3140_s11, %s2173_s22  ;;  %p2505_p12 = scmp.ne.s32.totalorder %s3083_s24, %s2504_s21 }
  0x47   : > { %2080 = vmatmul.mubr.msk.bf16.gmra.mxu1 %vm720_vm2, %v2327_v9  ;;  %v2372_v40 = vld [vmem:[%s3134_s5 + $0xd4] ss:$8 sps:$4 sm:$0xff]   ;;  %v2370_v41 = vld [vmem:[%s3134_s5 + $0xd0] ss:$8 sps:$4 sm:$0xff]   ;;  %v2381_v48 = vld [vmem:[%s3134_s5 + $0xa4] ss:$8 sps:$4 sm:$0xff]   ;;  %p2512_p0 = scmp.lt.s32.totalorder %s2510_s23, %s2504_s21 }
  0x48   : > { %2062 = vmatmul.mubr.msk.bf16.gmra.mxu0 %vm525_vm1, %v2326_v8  ;;  %797 = vmatprep.mubr.bf16.mxu1 %v2580_v0  ;;  %v2378_v46 = vld [vmem:[%s3134_s5 + $0xb4] ss:$8 sps:$4 sm:$0xff]   ;;  %v2376_v47 = vld [vmem:[%s3134_s5 + $0xb0] ss:$8 sps:$4 sm:$0xff]   ;;  %v2379_v49 = vld [vmem:[%s3134_s5 + $0xa0] ss:$8 sps:$4 sm:$0xff]   ;;  %p2506_p7 = pnand %p2505_p12, %p2682_p5 }
  0x49   : > { %609 = vmatprep.mubr.bf16.mxu0 %v2580_v0  ;;  %1159 = vmatpush1.bf16.msra.mxu0 %v2346_v17  ;;  %v2384_v50 = vld [vmem:[%s3134_s5 + $0x94] ss:$8 sps:$4 sm:$0xff]   ;;  %v2382_v51 = vld [vmem:[%s3134_s5 + $0x90] ss:$8 sps:$4 sm:$0xff]   ;;  %v2387_v52 = vld [vmem:[%s3134_s5 + $0x84] ss:$8 sps:$4 sm:$0xff]   ;;  %p2513_p1 = por %p2512_p0, %p2511_p11 }
  0x4a   : > { %1160 = vmatprep.subr.bf16.mxu0 %v2351_v19  ;;  %v2385_v53 = vld [vmem:[%s3134_s5 + $0x80] ss:$8 sps:$4 sm:$0xff]   ;;  %v2388_v54 = vld [vmem:[#allocation2 + $0x70] ss:$8 sps:$4 sm:$0xff]   ;;  %v2390_v55 = vld [vmem:[#allocation2 + $0x74] ss:$8 sps:$4 sm:$0xff]   ;;  %p2507_p8 = pneg %p2506_p7 }
  0x4b   : > { %v2393_v56 = vld [vmem:[#allocation2 + $0x64] ss:$8 sps:$4 sm:$0xff]   ;;  %1519 = vmatprep.subr.bf16.mxu1 %v2390_v55  ;;  %v2391_v57 = vld [vmem:[#allocation2 + $0x60] ss:$8 sps:$4 sm:$0xff]   ;;  %v2396_v58 = vld [vmem:[#allocation2 + $0x54] ss:$8 sps:$4 sm:$0xff]  }
  0x4c   : > { %1520 = vmatpush1.bf16.msra.mxu1 %v2388_v54  ;;  %v2394_v59 = vld [vmem:[#allocation2 + $0x50] ss:$8 sps:$4 sm:$0xff]   ;;  %v2399_v60 = vld [vmem:[#allocation2 + $0x44] ss:$8 sps:$4 sm:$0xff]   ;;  %v2397_v61 = vld [vmem:[#allocation2 + $0x40] ss:$8 sps:$4 sm:$0xff]   ;;  %p2514_p3 = pnand %p2513_p1, %p2507_p8 }
  0x4d   : > { %1161 = vmatpush1.bf16.msra.mxu0 %v2349_v21  ;;  %1521 = vmatprep.subr.bf16.mxu1 %v2393_v56  ;;  %v2402_v62 = vld [vmem:[#allocation2 + $0x34] ss:$8 sps:$4 sm:$0xff]   ;;  %v2400_v63 = vld [vmem:[#allocation2 + $0x30] ss:$8 sps:$4 sm:$0xff]   ;;  %v2403_v1 = vld [vmem:[#allocation2 + $0x20] ss:$8 sps:$4 sm:$0xff]  }
  0x4e   : > { %1162 = vmatprep.subr.bf16.mxu0 %v2354_v22  ;;  %v2408_v2 = vld [vmem:[#allocation2 + $0x14] ss:$8 sps:$4 sm:$0xff]   ;;  %v2406_v3 = vld [vmem:[#allocation2 + $0x10] ss:$8 sps:$4 sm:$0xff]   ;;  %v2411_v4 = vld [vmem:[#allocation2 + $0x4] ss:$8 sps:$4 sm:$0xff]  }
  0x4f   : > { %2081 = vmatmul.mubr.msk.bf16.gmra.mxu1 %vm720_vm2, %v2329_v13  ;;  %v2409_v5 = vld [vmem:[#allocation2] ss:$8 sps:$4 sm:$0xff]   ;;  %v2414_v6 = vld [vmem:[#allocation2 + $0xf4] ss:$8 sps:$4 sm:$0xff]   ;;  %v2412_v7 = vld [vmem:[#allocation2 + $0xf0] ss:$8 sps:$4 sm:$0xff]  }
  0x50   : > { %2063 = vmatmul.mubr.msk.bf16.gmra.mxu0 %vm525_vm1, %v2328_v10  ;;  %807 = vmatprep.mubr.bf16.mxu1 %v2580_v0  ;;  %v2417_v8 = vld [vmem:[#allocation2 + $0xe4] ss:$8 sps:$4 sm:$0xff]   ;;  %v2415_v9 = vld [vmem:[#allocation2 + $0xe0] ss:$8 sps:$4 sm:$0xff]   ;;  %v2420_v10 = vld [vmem:[#allocation2 + $0xd4] ss:$8 sps:$4 sm:$0xff]  }
  0x51   : > { %619 = vmatprep.mubr.bf16.mxu0 %v2580_v0  ;;  %1163 = vmatpush1.bf16.msra.mxu0 %v2352_v24  ;;  %v2418_v11 = vld [vmem:[#allocation2 + $0xd0] ss:$8 sps:$4 sm:$0xff]   ;;  %v2423_v12 = vld [vmem:[#allocation2 + $0xc4] ss:$8 sps:$4 sm:$0xff]   ;;  %v2421_v13 = vld [vmem:[#allocation2 + $0xc0] ss:$8 sps:$4 sm:$0xff]  }
  0x52   : > { %1164 = vmatprep.subr.bf16.mxu0 %v2357_v26  ;;  %1522 = vmatpush1.bf16.msra.mxu1 %v2391_v57  ;;  %v2426_v14 = vld [vmem:[#allocation2 + $0xb4] ss:$8 sps:$4 sm:$0xff]   ;;  %v2424_v15 = vld [vmem:[#allocation2 + $0xb0] ss:$8 sps:$4 sm:$0xff]   ;;  %v861_v17 = vshrl.u32 %v860_v16, 7 }
  0x53   : > { %1523 = vmatprep.subr.bf16.mxu1 %v2396_v58  ;;  %v858_v22 = vld [vmem:[%s3133_s4] sm:$0x3] }
  0x54   : > { %v2899_v21 = vsub.s32 0, %v861_v17 }
  0x55   : > { %1165 = vmatpush1.bf16.msra.mxu0 %v2355_v27 }
  0x56   : > { %1166 = vmatprep.subr.bf16.mxu0 %v2360_v28  ;;  %1524 = vmatpush1.bf16.msra.mxu1 %v2394_v59  ;;  %v2908_v28 = vrot.slane %v858_v22, %v2899_v21 }
  0x57   : > { %2082 = vmatmul.mubr.msk.bf16.gmra.mxu1 %vm720_vm2, %v2331_v20  ;;  %1525 = vmatprep.subr.bf16.mxu1 %v2399_v60 }
  0x58   : > { %2064 = vmatmul.mubr.msk.bf16.gmra.mxu0 %vm525_vm1, %v2330_v18  ;;  %817 = vmatprep.mubr.bf16.mxu1 %v2580_v0  ;;  %v2897_v18 = vsub.s32 1, %v861_v17 }
  0x59   : > { %629 = vmatprep.mubr.bf16.mxu0 %v2580_v0  ;;  %1167 = vmatpush1.bf16.msra.mxu0 %v2358_v29 }
  0x5a   : > { %1168 = vmatprep.subr.bf16.mxu0 %v2363_v30  ;;  %1526 = vmatpush1.bf16.msra.mxu1 %v2397_v61  ;;  %v2905_v26 = vrot.slane %v858_v22, %v2897_v18 }
  0x5b   : > { %1527 = vmatprep.subr.bf16.mxu1 %v2402_v62 }
  0x5d   : > { %1169 = vmatpush1.bf16.msra.mxu0 %v2361_v33 }
  0x5e   : > { %1170 = vmatprep.subr.bf16.mxu0 %v2366_v34  ;;  %1528 = vmatpush1.bf16.msra.mxu1 %v2400_v63 }
  0x5f   : > { %2083 = vmatmul.mubr.msk.bf16.gmra.mxu1 %vm720_vm2, %v2333_v25 }
  0x60   : > { %2065 = vmatmul.mubr.msk.bf16.gmra.mxu0 %vm525_vm1, %v2332_v23  ;;  %827 = vmatprep.mubr.bf16.mxu1 %v2580_v0 }
  0x61   : > { %639 = vmatprep.mubr.bf16.mxu0 %v2580_v0  ;;  %1171 = vmatpush2.bf16.msra.mxu0 %v2364_v35 }
  0x62   : > { %1172 = vmatprep.subr.bf16.mxu0 %v2369_v36 }
  0x65   : > { %1173 = vmatpush2.bf16.msra.mxu0 %v2367_v39 }
  0x66   : > { %1174 = vmatprep.subr.bf16.mxu0 %v2372_v40 }
  0x67   : > { %2084 = vmatmul.mubr.msk.bf16.gmra.mxu1 %vm720_vm2, %v2335_v32 }
  0x68   : > { %2066 = vmatmul.mubr.msk.bf16.gmra.mxu0 %vm525_vm1, %v2334_v31  ;;  %837 = vmatprep.mubr.bf16.mxu1 %v2580_v0 }
  0x69   : > { %649 = vmatprep.mubr.bf16.mxu0 %v2580_v0  ;;  %1175 = vmatpush2.bf16.msra.mxu0 %v2370_v41 }
  0x6a   : > { %1176 = vmatprep.subr.bf16.mxu0 %v2375_v42 }
  0x6d   : > { %1177 = vmatpush2.bf16.msra.mxu0 %v2373_v45 }
  0x6e   : > { %1178 = vmatprep.subr.bf16.mxu0 %v2378_v46 }
  0x6f   : > { %2085 = vmatmul.mubr.msk.bf16.gmra.mxu1 %vm720_vm2, %v2337_v38 }
  0x70   : > { %2067 = vmatmul.mubr.msk.bf16.gmra.mxu0 %vm525_vm1, %v2336_v37  ;;  %847 = vmatprep.mubr.bf16.mxu1 %v2580_v0 }
  0x71   : > { %659 = vmatprep.mubr.bf16.mxu0 %v2580_v0  ;;  %1179 = vmatpush2.bf16.msra.mxu0 %v2376_v47  ;;  %v2405_v0 = vld [vmem:[#allocation2 + $0x24] ss:$8 sps:$4 sm:$0xff]  }
  0x72   : > { %1180 = vmatprep.subr.bf16.mxu0 %v2381_v48  ;;  %1529 = vmatprep.subr.bf16.mxu1 %v2405_v0 }
  0x73   : > { %1530 = vmatpush1.bf16.msra.mxu1 %v2403_v1 }
  0x74   : > { %1531 = vmatprep.subr.bf16.mxu1 %v2408_v2 }
  0x75   : > { %1181 = vmatpush2.bf16.msra.mxu0 %v2379_v49 }
  0x76   : > { %1182 = vmatprep.subr.bf16.mxu0 %v2384_v50 }
  0x77   : > { %2086 = vmatmul.mubr.msk.bf16.gmra.mxu1 %vm720_vm2, %v2339_v44 }
  0x78   : > { %2068 = vmatmul.mubr.msk.bf16.gmra.mxu0 %vm525_vm1, %v2338_v43  ;;  %1532 = vmatpush1.bf16.msra.mxu1 %v2406_v3 }
  0x79   : > { %1183 = vmatpush2.bf16.msra.mxu0 %v2382_v51  ;;  %1533 = vmatprep.subr.bf16.mxu1 %v2411_v4 }
  0x7a   : > { %1184 = vmatprep.subr.bf16.mxu0 %v2387_v52 }
  0x7c   : > { %1534 = vmatpush1.bf16.msra.mxu1 %v2409_v5 }
  0x7d   : > { %1185 = vmatpush2.bf16.msra.mxu0 %v2385_v53  ;;  %1535 = vmatprep.subr.bf16.mxu1 %v2414_v6 }
  0x80   : > { %1536 = vmatpush2.bf16.msra.mxu1 %v2412_v7 }
  0x81   : > { %1537 = vmatprep.subr.bf16.mxu1 %v2417_v8 }
  0x84   : > { %1538 = vmatpush2.bf16.msra.mxu1 %v2415_v9 }
  0x85   : > { %1539 = vmatprep.subr.bf16.mxu1 %v2420_v10 }
  0x88   : > { %1540 = vmatpush2.bf16.msra.mxu1 %v2418_v11 }
  0x89   : > { %1541 = vmatprep.subr.bf16.mxu1 %v2423_v12 }
  0x8c   : > { %1542 = vmatpush2.bf16.msra.mxu1 %v2421_v13 }
  0x8d   : > { %1543 = vmatprep.subr.bf16.mxu1 %v2426_v14 }
  0x90   : > { %1544 = vmatpush2.bf16.msra.mxu1 %v2424_v15 }
  0xff   : > { %v779_v20 = vpop.f32.mrf.mxu1 }
 0x100   : > { %v591_v19 = vpop.f32.mrf.mxu0 }
 0x101   : > { %v781_v24 = vpop.f32.mrf.mxu1  ;;  %v780_v27 = vadd.f32 %v779_v20, %v591_v19 }
 0x102   : > { %v593_v23 = vpop.f32.mrf.mxu0 }
 0x103   : > { %v782_v25 = vadd.f32 %v781_v24, %v593_v23  ;;  %v783_v30 = vpop.f32.mrf.mxu1  ;;  %v870_v37 = vadd.f32 %v2908_v28, %v780_v27 }
 0x104   : > { %v595_v29 = vpop.f32.mrf.mxu0 }
 0x105   : > { %v784_v31 = vadd.f32 %v783_v30, %v595_v29  ;;  %v785_v33 = vpop.f32.mrf.mxu1  ;;  %v871_v34 = vadd.f32 %v2905_v26, %v782_v25  ;;  %v902_v47 = vmax.f32 %v870_v37, 0.0 }
 0x106   : > { %v597_v32 = vpop.f32.mrf.mxu0 }
 0x107   : > { %v872_v35 = vadd.f32 %v2908_v28, %v784_v31  ;;  %v786_v36 = vadd.f32 %v785_v33, %v597_v32  ;;  %v789_v39 = vpop.f32.mrf.mxu1  ;;  %v903_v44 = vmax.f32 %v871_v34, 0.0 }
 0x108   : > { %v601_v38 = vpop.f32.mrf.mxu0 }
 0x109   : > { %v873_v40 = vadd.f32 %v2905_v26, %v786_v36  ;;  %v904_v41 = vmax.f32 %v872_v35, 0.0  ;;  %v791_v43 = vpop.f32.mrf.mxu1  ;;  %v790_v48 = vadd.f32 %v789_v39, %v601_v38 }
 0x10a   : > { %v603_v42 = vpop.f32.mrf.mxu0 }
 0x10b   : > { %v905_v45 = vmax.f32 %v873_v40, 0.0  ;;  %v792_v46 = vadd.f32 %v791_v43, %v603_v42  ;;  %v793_v50 = vpop.f32.mrf.mxu1  ;;  %v934_v53 = vpack.c.bf16 %v904_v41, %v902_v47  ;;  %v874_v59 = vadd.f32 %v2908_v28, %v790_v48 }
 0x10c   : > { %v605_v49 = vpop.f32.mrf.mxu0 }
 0x10d   : > { %v794_v51 = vadd.f32 %v793_v50, %v605_v49  ;;  %v935_v52 = vpack.c.bf16 %v905_v45, %v903_v44  ;;  %v795_v55 = vpop.f32.mrf.mxu1  ;;  %v875_v56 = vadd.f32 %v2905_v26, %v792_v46  ;;  %v906_v5 = vmax.f32 %v874_v59, 0.0 }
 0x10e   : > { %v607_v54 = vpop.f32.mrf.mxu0 }
 0x10f   : > { %v876_v57 = vadd.f32 %v2908_v28, %v794_v51  ;;  %v796_v58 = vadd.f32 %v795_v55, %v607_v54  ;;  %1186 = vmatprep.mubr.bf16.mxu0 %v935_v52  ;;  %v799_v61 = vpop.f32.mrf.mxu1  ;;  %v907_v2 = vmax.f32 %v875_v56, 0.0 }
 0x110   : > { %v611_v60 = vpop.f32.mrf.mxu0  ;;  %1187 = vmatmul.mubr.bf16.vlgmr.msra.gmra.mxu0 %v934_v53 }
 0x111   : > { %v877_v62 = vadd.f32 %v2905_v26, %v796_v58  ;;  %v908_v63 = vmax.f32 %v876_v57, 0.0  ;;  %v801_v1 = vpop.f32.mrf.mxu1  ;;  %v800_v6 = vadd.f32 %v799_v61, %v611_v60 }
 0x112   : > { %v613_v0 = vpop.f32.mrf.mxu0 }
 0x113   : > { %v909_v3 = vmax.f32 %v877_v62, 0.0  ;;  %v802_v4 = vadd.f32 %v801_v1, %v613_v0  ;;  %v803_v8 = vpop.f32.mrf.mxu1  ;;  %v936_v13 = vpack.c.bf16 %v908_v63, %v906_v5  ;;  %v878_v17 = vadd.f32 %v2908_v28, %v800_v6 }
 0x114   : > { %v615_v7 = vpop.f32.mrf.mxu0 }
 0x115   : > { %v804_v9 = vadd.f32 %v803_v8, %v615_v7  ;;  %v937_v10 = vpack.c.bf16 %v909_v3, %v907_v2  ;;  %v805_v12 = vpop.f32.mrf.mxu1  ;;  %v879_v14 = vadd.f32 %v2905_v26, %v802_v4  ;;  %v910_v31 = vmax.f32 %v878_v17, 0.0 }
 0x116   : > { %v617_v11 = vpop.f32.mrf.mxu0 }
 0x117   : > { %v880_v15 = vadd.f32 %v2908_v28, %v804_v9  ;;  %v806_v16 = vadd.f32 %v805_v12, %v617_v11  ;;  %1196 = vmatprep.mubr.bf16.mxu0 %v937_v10  ;;  %v809_v20 = vpop.f32.mrf.mxu1  ;;  %v911_v27 = vmax.f32 %v879_v14, 0.0 }
 0x118   : > { %v621_v19 = vpop.f32.mrf.mxu0  ;;  %1197 = vmatmul.mubr.bf16.gmra.mxu0 %v936_v13 }
 0x119   : > { %v881_v22 = vadd.f32 %v2905_v26, %v806_v16  ;;  %v912_v23 = vmax.f32 %v880_v15, 0.0  ;;  %v811_v25 = vpop.f32.mrf.mxu1  ;;  %v810_v32 = vadd.f32 %v809_v20, %v621_v19 }
 0x11a   : > { %v623_v24 = vpop.f32.mrf.mxu0 }
 0x11b   : > { %v913_v29 = vmax.f32 %v881_v22, 0.0  ;;  %v812_v30 = vadd.f32 %v811_v25, %v623_v24  ;;  %v813_v34 = vpop.f32.mrf.mxu1  ;;  %v938_v39 = vpack.c.bf16 %v912_v23, %v910_v31  ;;  %v882_v43 = vadd.f32 %v2908_v28, %v810_v32 }
 0x11c   : > { %v625_v33 = vpop.f32.mrf.mxu0 }
 0x11d   : > { %v814_v35 = vadd.f32 %v813_v34, %v625_v33  ;;  %v939_v36 = vpack.c.bf16 %v913_v29, %v911_v27  ;;  %v815_v38 = vpop.f32.mrf.mxu1  ;;  %v883_v40 = vadd.f32 %v2905_v26, %v812_v30  ;;  %v914_v53 = vmax.f32 %v882_v43, 0.0 }
 0x11e   : > { %v627_v37 = vpop.f32.mrf.mxu0 }
 0x11f   : > { %v884_v41 = vadd.f32 %v2908_v28, %v814_v35  ;;  %v816_v42 = vadd.f32 %v815_v38, %v627_v37  ;;  %1206 = vmatprep.mubr.bf16.mxu0 %v939_v36  ;;  %v819_v45 = vpop.f32.mrf.mxu1  ;;  %v915_v50 = vmax.f32 %v883_v40, 0.0 }
 0x120   : > { %v631_v44 = vpop.f32.mrf.mxu0  ;;  %1207 = vmatmul.mubr.bf16.gmra.mxu0 %v938_v39 }
 0x121   : > { %v885_v46 = vadd.f32 %v2905_v26, %v816_v42  ;;  %v916_v47 = vmax.f32 %v884_v41, 0.0  ;;  %v821_v49 = vpop.f32.mrf.mxu1  ;;  %v820_v54 = vadd.f32 %v819_v45, %v631_v44 }
 0x122   : > { %v633_v48 = vpop.f32.mrf.mxu0 }
 0x123   : > { %v917_v51 = vmax.f32 %v885_v46, 0.0  ;;  %v822_v52 = vadd.f32 %v821_v49, %v633_v48  ;;  %v823_v56 = vpop.f32.mrf.mxu1  ;;  %v940_v61 = vpack.c.bf16 %v916_v47, %v914_v53  ;;  %v886_v1 = vadd.f32 %v2908_v28, %v820_v54 }
 0x124   : > { %v635_v55 = vpop.f32.mrf.mxu0 }
 0x125   : > { %v824_v57 = vadd.f32 %v823_v56, %v635_v55  ;;  %v941_v58 = vpack.c.bf16 %v917_v51, %v915_v50  ;;  %v825_v60 = vpop.f32.mrf.mxu1  ;;  %v887_v62 = vadd.f32 %v2905_v26, %v822_v52  ;;  %v918_v11 = vmax.f32 %v886_v1, 0.0 }
 0x126   : > { %v637_v59 = vpop.f32.mrf.mxu0 }
 0x127   : > { %v888_v63 = vadd.f32 %v2908_v28, %v824_v57  ;;  %v826_v0 = vadd.f32 %v825_v60, %v637_v59  ;;  %1216 = vmatprep.mubr.bf16.mxu0 %v941_v58  ;;  %v829_v3 = vpop.f32.mrf.mxu1  ;;  %v919_v8 = vmax.f32 %v887_v62, 0.0 }
 0x128   : > { %v641_v2 = vpop.f32.mrf.mxu0  ;;  %1217 = vmatmul.mubr.bf16.gmra.mxu0 %v940_v61 }
 0x129   : > { %v889_v4 = vadd.f32 %v2905_v26, %v826_v0  ;;  %v920_v5 = vmax.f32 %v888_v63, 0.0  ;;  %v831_v7 = vpop.f32.mrf.mxu1  ;;  %v830_v12 = vadd.f32 %v829_v3, %v641_v2 }
 0x12a   : > { %v643_v6 = vpop.f32.mrf.mxu0 }
 0x12b   : > { %v921_v9 = vmax.f32 %v889_v4, 0.0  ;;  %v832_v10 = vadd.f32 %v831_v7, %v643_v6  ;;  %v833_v14 = vpop.f32.mrf.mxu1  ;;  %v942_v20 = vpack.c.bf16 %v920_v5, %v918_v11  ;;  %v890_v25 = vadd.f32 %v2908_v28, %v830_v12 }
 0x12c   : > { %v645_v13 = vpop.f32.mrf.mxu0 }
 0x12d   : > { %v834_v15 = vadd.f32 %v833_v14, %v645_v13  ;;  %v943_v16 = vpack.c.bf16 %v921_v9, %v919_v8  ;;  %v835_v19 = vpop.f32.mrf.mxu1  ;;  %v891_v22 = vadd.f32 %v2905_v26, %v832_v10  ;;  %v922_v37 = vmax.f32 %v890_v25, 0.0  ;;  %v2440_v25 = vld [vmem:[#allocation5 + $0x68] sm:$0xff]  }
 0x12e   : > { %v647_v17 = vpop.f32.mrf.mxu0 }
 0x12f   : > { %v892_v23 = vadd.f32 %v2908_v28, %v834_v15  ;;  %v836_v24 = vadd.f32 %v835_v19, %v647_v17  ;;  %1226 = vmatprep.mubr.bf16.mxu0 %v943_v16  ;;  %v839_v29 = vpop.f32.mrf.mxu1  ;;  %v923_v34 = vmax.f32 %v891_v22, 0.0  ;;  %v2429_v15 = vld [vmem:[#allocation2 + $0xa4] ss:$8 sps:$4 sm:$0xff]   ;;  %v2427_v16 = vld [vmem:[#allocation2 + $0xa0] ss:$8 sps:$4 sm:$0xff]   ;;  %v2437_v22 = vld [vmem:[#allocation5 + $0x38] sm:$0xff]  }
 0x130   : > { %v651_v27 = vpop.f32.mrf.mxu0  ;;  %1227 = vmatmul.mubr.bf16.gmra.mxu0 %v942_v20  ;;  %1545 = vmatprep.subr.bf16.mxu1 %v2429_v15  ;;  %v2432_v17 = vld [vmem:[#allocation2 + $0x94] ss:$8 sps:$4 sm:$0xff]   ;;  %v2430_v19 = vld [vmem:[#allocation2 + $0x90] ss:$8 sps:$4 sm:$0xff]   ;;  %v2433_v20 = vld [vmem:[#allocation2 + $0x80] ss:$8 sps:$4 sm:$0xff]  }
 0x131   : > { %v893_v30 = vadd.f32 %v2905_v26, %v836_v24  ;;  %v924_v31 = vmax.f32 %v892_v23, 0.0  ;;  %v841_v33 = vpop.f32.mrf.mxu1  ;;  %v840_v38 = vadd.f32 %v839_v29, %v651_v27  ;;  %1546 = vmatpush2.bf16.msra.mxu1 %v2427_v16  ;;  %v2438_v23 = vld [vmem:[#allocation5 + $0x70] sm:$0xff]   ;;  %v2441_v27 = vld [vmem:[#allocation5 + $0x28] sm:$0xff]   ;;  %v2442_v29 = vld [vmem:[#allocation5 + $0x60] sm:$0xff]  }
 0x132   : > { %v653_v32 = vpop.f32.mrf.mxu0  ;;  %1547 = vmatprep.subr.bf16.mxu1 %v2432_v17  ;;  %v2439_v24 = vld [vmem:[#allocation5 + $0x30] sm:$0xff]  }
 0x133   : > { %v925_v35 = vmax.f32 %v893_v30, 0.0  ;;  %v842_v36 = vadd.f32 %v841_v33, %v653_v32  ;;  %v843_v40 = vpop.f32.mrf.mxu1  ;;  %v944_v45 = vpack.c.bf16 %v924_v31, %v922_v37  ;;  %v894_v49 = vadd.f32 %v2908_v28, %v840_v38  ;;  %v2942_v30 = vld [vmem:[#allocation5 + $0x20] sm:$0xff]   ;;  %v2944_v31 = vld [vmem:[#allocation5 + $0x58] sm:$0xff]  }
 0x134   : > { %v655_v39 = vpop.f32.mrf.mxu0  ;;  %v2947_v32 = vld [vmem:[#allocation5 + $0x18] sm:$0xff]   ;;  %v982_v33 = vld [vmem:[%s3135_s6] sm:$0x3] }
 0x135   : > { %v844_v41 = vadd.f32 %v843_v40, %v655_v39  ;;  %v945_v42 = vpack.c.bf16 %v925_v35, %v923_v34  ;;  %v845_v44 = vpop.f32.mrf.mxu1  ;;  %v895_v46 = vadd.f32 %v2905_v26, %v842_v36  ;;  %v926_v59 = vmax.f32 %v894_v49, 0.0  ;;  %1548 = vmatpush2.bf16.msra.mxu1 %v2430_v19 }
 0x136   : > { %v657_v43 = vpop.f32.mrf.mxu0  ;;  %v2955_v35 = vrot.slane %v982_v33, %v2897_v18  ;;  %v2958_v36 = vrot.slane %v982_v33, %v2899_v21 }
 0x137   : > { %v896_v47 = vadd.f32 %v2908_v28, %v844_v41  ;;  %v846_v48 = vadd.f32 %v845_v44, %v657_v43  ;;  %1236 = vmatprep.mubr.bf16.mxu0 %v945_v42  ;;  %v849_v51 = vpop.f32.mrf.mxu1  ;;  %v927_v56 = vmax.f32 %v895_v46, 0.0 }
 0x138   : > { %v661_v50 = vpop.f32.mrf.mxu0  ;;  %1237 = vmatmul.mubr.bf16.gmra.mxu0 %v944_v45 }
 0x139   : > { %v897_v52 = vadd.f32 %v2905_v26, %v846_v48  ;;  %v928_v53 = vmax.f32 %v896_v47, 0.0  ;;  %v851_v55 = vpop.f32.mrf.mxu1  ;;  %v850_v60 = vadd.f32 %v849_v51, %v661_v50 }
 0x13a   : > { %v663_v54 = vpop.f32.mrf.mxu0 }
 0x13b   : > { %v929_v57 = vmax.f32 %v897_v52, 0.0  ;;  %v852_v58 = vadd.f32 %v851_v55, %v663_v54  ;;  %v853_v62 = vpop.f32.mrf.mxu1  ;;  %v946_v3 = vpack.c.bf16 %v928_v53, %v926_v59  ;;  %v898_v7 = vadd.f32 %v2908_v28, %v850_v60 }
 0x13c   : > { %v665_v61 = vpop.f32.mrf.mxu0 }
 0x13d   : > { %v854_v63 = vadd.f32 %v853_v62, %v665_v61  ;;  %v947_v0 = vpack.c.bf16 %v929_v57, %v927_v56  ;;  %v855_v2 = vpop.f32.mrf.mxu1  ;;  %v899_v4 = vadd.f32 %v2905_v26, %v852_v58  ;;  %v930_v12 = vmax.f32 %v898_v7, 0.0 }
 0x13e   : > { %v667_v1 = vpop.f32.mrf.mxu0 }
 0x13f   : > { %v900_v5 = vadd.f32 %v2908_v28, %v854_v63  ;;  %v856_v6 = vadd.f32 %v855_v2, %v667_v1  ;;  %1246 = vmatprep.mubr.bf16.mxu0 %v947_v0  ;;  %v931_v10 = vmax.f32 %v899_v4, 0.0  ;;  %v2435_v28 = vld [vmem:[#allocation2 + $0x84] ss:$8 sps:$4 sm:$0xff]  }
 0x140   : > { %1247 = vmatmul.mubr.bf16.gmra.mxu0 %v946_v3  ;;  %1549 = vmatprep.subr.bf16.mxu1 %v2435_v28 }
 0x141   : > { %v901_v8 = vadd.f32 %v2905_v26, %v856_v6  ;;  %v932_v9 = vmax.f32 %v900_v5, 0.0  ;;  %1550 = vmatpush2.bf16.msra.mxu1 %v2433_v20  ;;  %v2436_v26 = vld [vmem:[#allocation5 + $0x78] sm:$0xff]  }
 0x142   : > { %2174 = vmatprep.subr.bf16.mxu0 %v2436_v26  ;;  %2238 = vmatprep.subr.bf16.mxu1 %v2436_v26 }
 0x143   : > { %v933_v11 = vmax.f32 %v901_v8, 0.0  ;;  %v948_v14 = vpack.c.bf16 %v932_v9, %v930_v12  ;;  %2175 = vmatpush3.bf16.msra.mxu0 %v2437_v22 }
 0x144   : > { %2176 = vmatprep.subr.bf16.mxu0 %v2438_v23 }
 0x145   : > { %v949_v13 = vpack.c.bf16 %v933_v11, %v931_v10 }
 0x147   : > { %1256 = vmatprep.mubr.bf16.mxu0 %v949_v13  ;;  %2177 = vmatpush3.bf16.msra.mxu0 %v2439_v24 }
 0x148   : > { %1257 = vmatmul.mubr.bf16.gmra.mxu0 %v948_v14  ;;  %2178 = vmatprep.subr.bf16.mxu0 %v2440_v25 }
 0x14b   : > { %2179 = vmatpush3.bf16.msra.mxu0 %v2441_v27 }
 0x14c   : > { %2180 = vmatprep.subr.bf16.mxu0 %v2442_v29 }
 0x14f   : > { %2181 = vmatpush3.bf16.msra.mxu0 %v2942_v30 }
 0x150   : > { %2182 = vmatprep.subr.bf16.mxu0 %v2944_v31 }
 0x153   : > { %2183 = vmatpush3.bf16.msra.mxu0 %v2947_v32 }
 0x1d0   : > { %v1188_v34 = vpop.f32.mrf.mxu0 }
 0x1d1   : > { %v1189_v41 = vadd.f32 %v1188_v34, %v2958_v36 }
 0x1d2   : > { %v1190_v37 = vpop.f32.mrf.mxu0 }
 0x1d3   : > { %v1191_v39 = vadd.f32 %v1190_v37, %v2955_v35  ;;  %v1267_v48 = vmax.f32 %v1189_v41, 0.0 }
 0x1d4   : > { %v1192_v38 = vpop.f32.mrf.mxu0 }
 0x1d5   : > { %v1193_v40 = vadd.f32 %v1192_v38, %v2958_v36  ;;  %v1268_v46 = vmax.f32 %v1191_v39, 0.0 }
 0x1d6   : > { %v1194_v42 = vpop.f32.mrf.mxu0 }
 0x1d7   : > { %v1195_v43 = vadd.f32 %v1194_v42, %v2955_v35  ;;  %v1269_v44 = vmax.f32 %v1193_v40, 0.0 }
 0x1d8   : > { %v1198_v45 = vpop.f32.mrf.mxu0 }
 0x1d9   : > { %v1270_v47 = vmax.f32 %v1195_v43, 0.0  ;;  %v1299_v51 = vpack.c.bf16 %v1269_v44, %v1267_v48  ;;  %v1199_v55 = vadd.f32 %v1198_v45, %v2958_v36 }
 0x1da   : > { %v1200_v49 = vpop.f32.mrf.mxu0 }
 0x1db   : > { %v1300_v50 = vpack.c.bf16 %v1270_v47, %v1268_v46  ;;  %v1201_v53 = vadd.f32 %v1200_v49, %v2955_v35  ;;  %v1271_v62 = vmax.f32 %v1199_v55, 0.0 }
 0x1dc   : > { %v1202_v52 = vpop.f32.mrf.mxu0 }
 0x1dd   : > { %v1203_v54 = vadd.f32 %v1202_v52, %v2958_v36  ;;  %1551 = vmatprep.mubr.bf16.mxu1 %v1300_v50  ;;  %v1272_v60 = vmax.f32 %v1201_v53, 0.0 }
 0x1de   : > { %v1204_v56 = vpop.f32.mrf.mxu0  ;;  %1552 = vmatmul.mubr.bf16.vlgmr.msra.gmra.mxu1 %v1299_v51 }
 0x1df   : > { %v1205_v57 = vadd.f32 %v1204_v56, %v2955_v35  ;;  %2246 = vmatpush3.bf16.msra.mxu1 %v2437_v22  ;;  %v1273_v58 = vmax.f32 %v1203_v54, 0.0 }
 0x1e0   : > { %v1208_v59 = vpop.f32.mrf.mxu0  ;;  %2239 = vmatprep.subr.bf16.mxu1 %v2438_v23 }
 0x1e1   : > { %v1274_v61 = vmax.f32 %v1205_v57, 0.0  ;;  %v1301_v1 = vpack.c.bf16 %v1273_v58, %v1271_v62  ;;  %v1209_v5 = vadd.f32 %v1208_v59, %v2958_v36 }
 0x1e2   : > { %v1210_v63 = vpop.f32.mrf.mxu0 }
 0x1e3   : > { %v1302_v0 = vpack.c.bf16 %v1274_v61, %v1272_v60  ;;  %2247 = vmatpush3.bf16.msra.mxu1 %v2439_v24  ;;  %v1211_v3 = vadd.f32 %v1210_v63, %v2955_v35  ;;  %v1275_v12 = vmax.f32 %v1209_v5, 0.0 }
 0x1e4   : > { %v1212_v2 = vpop.f32.mrf.mxu0  ;;  %2240 = vmatprep.subr.bf16.mxu1 %v2440_v25 }
 0x1e5   : > { %v1213_v4 = vadd.f32 %v1212_v2, %v2958_v36  ;;  %1561 = vmatprep.mubr.bf16.mxu1 %v1302_v0  ;;  %v1276_v10 = vmax.f32 %v1211_v3, 0.0 }
 0x1e6   : > { %v1214_v6 = vpop.f32.mrf.mxu0  ;;  %1562 = vmatmul.mubr.bf16.gmra.mxu1 %v1301_v1 }
 0x1e7   : > { %v1215_v7 = vadd.f32 %v1214_v6, %v2955_v35  ;;  %2248 = vmatpush3.bf16.msra.mxu1 %v2441_v27  ;;  %v1277_v8 = vmax.f32 %v1213_v4, 0.0 }
 0x1e8   : > { %v1218_v9 = vpop.f32.mrf.mxu0  ;;  %2241 = vmatprep.subr.bf16.mxu1 %v2442_v29 }
 0x1e9   : > { %v1278_v11 = vmax.f32 %v1215_v7, 0.0  ;;  %v1303_v15 = vpack.c.bf16 %v1277_v8, %v1275_v12  ;;  %v1219_v28 = vadd.f32 %v1218_v9, %v2958_v36 }
 0x1ea   : > { %v1220_v13 = vpop.f32.mrf.mxu0 }
 0x1eb   : > { %v1304_v14 = vpack.c.bf16 %v1278_v11, %v1276_v10  ;;  %2249 = vmatpush3.bf16.msra.mxu1 %v2942_v30  ;;  %v1221_v17 = vadd.f32 %v1220_v13, %v2955_v35  ;;  %v1279_v27 = vmax.f32 %v1219_v28, 0.0 }
 0x1ec   : > { %v1222_v16 = vpop.f32.mrf.mxu0  ;;  %2242 = vmatprep.subr.bf16.mxu1 %v2944_v31 }
 0x1ed   : > { %v1223_v19 = vadd.f32 %v1222_v16, %v2958_v36  ;;  %1571 = vmatprep.mubr.bf16.mxu1 %v1304_v14  ;;  %v1280_v24 = vmax.f32 %v1221_v17, 0.0 }
 0x1ee   : > { %v1224_v20 = vpop.f32.mrf.mxu0  ;;  %1572 = vmatmul.mubr.bf16.gmra.mxu1 %v1303_v15 }
 0x1ef   : > { %v1225_v26 = vadd.f32 %v1224_v20, %v2955_v35  ;;  %2250 = vmatpush3.bf16.msra.mxu1 %v2947_v32  ;;  %v1281_v22 = vmax.f32 %v1223_v19, 0.0 }
 0x1f0   : > { %v1228_v23 = vpop.f32.mrf.mxu0 }
 0x1f1   : > { %v1282_v25 = vmax.f32 %v1225_v26, 0.0  ;;  %v1305_v31 = vpack.c.bf16 %v1281_v22, %v1279_v27  ;;  %v1229_v38 = vadd.f32 %v1228_v23, %v2958_v36  ;;  %v2448_v27 = vld [vmem:[#allocation5 + $0x48] sm:$0xff]  }
 0x1f2   : > { %v1230_v29 = vpop.f32.mrf.mxu0 }
 0x1f3   : > { %v1306_v30 = vpack.c.bf16 %v1282_v25, %v1280_v24  ;;  %v1231_v34 = vadd.f32 %v1230_v29, %v2955_v35  ;;  %v1283_v44 = vmax.f32 %v1229_v38, 0.0  ;;  %v2446_v24 = vld [vmem:[#allocation5 + $0x50] sm:$0xff]   ;;  %v2451_v29 = vld [vmem:[#allocation5] sm:$0xff]  }
 0x1f4   : > { %v1232_v33 = vpop.f32.mrf.mxu0  ;;  %v2447_v25 = vld [vmem:[#allocation5 + $0x10] sm:$0xff]   ;;  %2184 = vmatprep.subr.bf16.mxu0 %v2446_v24  ;;  %2243 = vmatprep.subr.bf16.mxu1 %v2446_v24 }
 0x1f5   : > { %v1233_v37 = vadd.f32 %v1232_v33, %v2958_v36  ;;  %1581 = vmatprep.mubr.bf16.mxu1 %v1306_v30  ;;  %v1284_v42 = vmax.f32 %v1231_v34, 0.0  ;;  %2185 = vmatpush3.bf16.msra.mxu0 %v2447_v25  ;;  %v1347_v30 = vld [vmem:[%s3137_s8] sm:$0x3] }
 0x1f6   : > { %v1234_v39 = vpop.f32.mrf.mxu0  ;;  %1582 = vmatmul.mubr.bf16.gmra.mxu1 %v1305_v31  ;;  %2186 = vmatprep.subr.bf16.mxu0 %v2448_v27  ;;  %v2999_v33 = vrot.slane %v1347_v30, %v2897_v18  ;;  %v3002_v34 = vrot.slane %v1347_v30, %v2899_v21 }
 0x1f7   : > { %v1235_v32 = vadd.f32 %v1234_v39, %v2955_v35  ;;  %v1285_v40 = vmax.f32 %v1233_v37, 0.0  ;;  %2251 = vmatpush3.bf16.msra.mxu1 %v2447_v25 }
 0x1f8   : > { %v1238_v41 = vpop.f32.mrf.mxu0  ;;  %2244 = vmatprep.subr.bf16.mxu1 %v2448_v27 }
 0x1f9   : > { %v1286_v43 = vmax.f32 %v1235_v32, 0.0  ;;  %v1307_v47 = vpack.c.bf16 %v1285_v40, %v1283_v44  ;;  %v1239_v51 = vadd.f32 %v1238_v41, %v2958_v36 }
 0x1fa   : > { %v1240_v45 = vpop.f32.mrf.mxu0 }
 0x1fb   : > { %v1308_v46 = vpack.c.bf16 %v1286_v43, %v1284_v42  ;;  %v1241_v49 = vadd.f32 %v1240_v45, %v2955_v35  ;;  %v1287_v58 = vmax.f32 %v1239_v51, 0.0 }
 0x1fc   : > { %v1242_v48 = vpop.f32.mrf.mxu0 }
 0x1fd   : > { %v1243_v50 = vadd.f32 %v1242_v48, %v2958_v36  ;;  %1591 = vmatprep.mubr.bf16.mxu1 %v1308_v46  ;;  %v1288_v56 = vmax.f32 %v1241_v49, 0.0 }
 0x1fe   : > { %v1244_v52 = vpop.f32.mrf.mxu0  ;;  %1592 = vmatmul.mubr.bf16.gmra.mxu1 %v1307_v47 }
 0x1ff   : > { %v1245_v53 = vadd.f32 %v1244_v52, %v2955_v35  ;;  %v1289_v54 = vmax.f32 %v1243_v50, 0.0 }
 0x200   : > { %v1248_v55 = vpop.f32.mrf.mxu0 }
 0x201   : > { %v1290_v57 = vmax.f32 %v1245_v53, 0.0  ;;  %v1309_v61 = vpack.c.bf16 %v1289_v54, %v1287_v58  ;;  %v1249_v1 = vadd.f32 %v1248_v55, %v2958_v36 }
 0x202   : > { %v1250_v59 = vpop.f32.mrf.mxu0 }
 0x203   : > { %v1310_v60 = vpack.c.bf16 %v1290_v57, %v1288_v56  ;;  %v1251_v63 = vadd.f32 %v1250_v59, %v2955_v35  ;;  %v1291_v8 = vmax.f32 %v1249_v1, 0.0 }
 0x204   : > { %v1252_v62 = vpop.f32.mrf.mxu0 }
 0x205   : > { %v1253_v0 = vadd.f32 %v1252_v62, %v2958_v36  ;;  %1601 = vmatprep.mubr.bf16.mxu1 %v1310_v60  ;;  %v1292_v6 = vmax.f32 %v1251_v63, 0.0 }
 0x206   : > { %v1254_v2 = vpop.f32.mrf.mxu0  ;;  %1602 = vmatmul.mubr.bf16.gmra.mxu1 %v1309_v61 }
 0x207   : > { %v1255_v3 = vadd.f32 %v1254_v2, %v2955_v35  ;;  %v1293_v4 = vmax.f32 %v1253_v0, 0.0 }
 0x208   : > { %v1258_v5 = vpop.f32.mrf.mxu0 }
 0x209   : > { %v1294_v7 = vmax.f32 %v1255_v3, 0.0  ;;  %v1311_v11 = vpack.c.bf16 %v1293_v4, %v1291_v8  ;;  %v1259_v15 = vadd.f32 %v1258_v5, %v2958_v36 }
 0x20a   : > { %v1260_v9 = vpop.f32.mrf.mxu0 }
 0x20b   : > { %v1312_v10 = vpack.c.bf16 %v1294_v7, %v1292_v6  ;;  %v1261_v13 = vadd.f32 %v1260_v9, %v2955_v35  ;;  %v1295_v26 = vmax.f32 %v1259_v15, 0.0 }
 0x20c   : > { %v1262_v12 = vpop.f32.mrf.mxu0 }
 0x20d   : > { %v1263_v14 = vadd.f32 %v1262_v12, %v2958_v36  ;;  %1611 = vmatprep.mubr.bf16.mxu1 %v1312_v10  ;;  %v1296_v28 = vmax.f32 %v1261_v13, 0.0  ;;  %v2449_v36 = vld [vmem:[#allocation5 + $0x8] sm:$0xff]  }
 0x20e   : > { %v1264_v16 = vpop.f32.mrf.mxu0  ;;  %1612 = vmatmul.mubr.bf16.gmra.mxu1 %v1311_v11  ;;  %2187 = vmatpush3.bf16.msra.mxu0 %v2449_v36 }
 0x20f   : > { %v1265_v17 = vadd.f32 %v1264_v16, %v2955_v35  ;;  %v1297_v19 = vmax.f32 %v1263_v14, 0.0  ;;  %2252 = vmatpush3.bf16.msra.mxu1 %v2449_v36  ;;  %v2450_v35 = vld [vmem:[#allocation5 + $0x40] sm:$0xff]  }
 0x210   : > { %2188 = vmatprep.subr.bf16.mxu0 %v2450_v35  ;;  %2245 = vmatprep.subr.bf16.mxu1 %v2450_v35 }
 0x211   : > { %v1298_v20 = vmax.f32 %v1265_v17, 0.0  ;;  %v1313_v23 = vpack.c.bf16 %v1297_v19, %v1295_v26 }
 0x212   : > { %2189 = vmatpush3.bf16.msra.mxu0 %v2451_v29 }
 0x213   : > { %v1314_v22 = vpack.c.bf16 %v1298_v20, %v1296_v28  ;;  %2253 = vmatpush3.bf16.msra.mxu1 %v2451_v29 }
 0x215   : > { %1621 = vmatprep.mubr.bf16.mxu1 %v1314_v22 }
 0x216   : > { %1622 = vmatmul.mubr.bf16.gmra.mxu1 %v1313_v23 }
 0x29e   : > { %v1553_v31 = vpop.f32.mrf.mxu1 }
 0x29f   : > { %v1554_v40 = vadd.f32 %v1553_v31, %v3002_v34 }
 0x2a0   : > { %v1555_v37 = vpop.f32.mrf.mxu1 }
 0x2a1   : > { %v1556_v39 = vadd.f32 %v1555_v37, %v2999_v33  ;;  %v1632_v18 = vmax.f32 %v1554_v40, 0.0 }
 0x2a2   : > { %v1557_v38 = vpop.f32.mrf.mxu1 }
 0x2a3   : > { %v1558_v32 = vadd.f32 %v1557_v38, %v3002_v34  ;;  %v1633_v45 = vmax.f32 %v1556_v39, 0.0 }
 0x2a4   : > { %v1559_v41 = vpop.f32.mrf.mxu1 }
 0x2a5   : > { %v1560_v42 = vadd.f32 %v1559_v41, %v2999_v33  ;;  %v1634_v43 = vmax.f32 %v1558_v32, 0.0 }
 0x2a6   : > { %v1563_v44 = vpop.f32.mrf.mxu1 }
 0x2a7   : > { %v1635_v46 = vmax.f32 %v1560_v42, 0.0  ;;  %v1664_v21 = vpack.c.bf16 %v1634_v43, %v1632_v18  ;;  %v1564_v52 = vadd.f32 %v1563_v44, %v3002_v34 }
 0x2a8   : > { %v1565_v47 = vpop.f32.mrf.mxu1 }
 0x2a9   : > { %v1665_v48 = vpack.c.bf16 %v1635_v46, %v1633_v45  ;;  %v1566_v50 = vadd.f32 %v1565_v47, %v2999_v33  ;;  %v1636_v59 = vmax.f32 %v1564_v52, 0.0 }
 0x2aa   : > { %v1567_v49 = vpop.f32.mrf.mxu1 }
 0x2ab   : > { %v1568_v51 = vadd.f32 %v1567_v49, %v3002_v34  ;;  %1847 = vmatprep.mubr.bf16.mxu0 %v1665_v48  ;;  %v1637_v57 = vmax.f32 %v1566_v50, 0.0 }
 0x2ac   : > { %v1569_v53 = vpop.f32.mrf.mxu1  ;;  %1848 = vmatmul.mubr.bf16.vlgmr.msra.gmra.mxu0 %v1664_v21 }
 0x2ad   : > { %v1570_v54 = vadd.f32 %v1569_v53, %v2999_v33  ;;  %v1638_v55 = vmax.f32 %v1568_v51, 0.0 }
 0x2ae   : > { %v1573_v56 = vpop.f32.mrf.mxu1 }
 0x2af   : > { %v1639_v58 = vmax.f32 %v1570_v54, 0.0  ;;  %v1666_v62 = vpack.c.bf16 %v1638_v55, %v1636_v59  ;;  %v1574_v2 = vadd.f32 %v1573_v56, %v3002_v34 }
 0x2b0   : > { %v1575_v60 = vpop.f32.mrf.mxu1 }
 0x2b1   : > { %v1667_v61 = vpack.c.bf16 %v1639_v58, %v1637_v57  ;;  %v1576_v0 = vadd.f32 %v1575_v60, %v2999_v33  ;;  %v1640_v9 = vmax.f32 %v1574_v2, 0.0 }
 0x2b2   : > { %v1577_v63 = vpop.f32.mrf.mxu1 }
 0x2b3   : > { %v1578_v1 = vadd.f32 %v1577_v63, %v3002_v34  ;;  %1855 = vmatprep.mubr.bf16.mxu0 %v1667_v61  ;;  %v1641_v7 = vmax.f32 %v1576_v0, 0.0 }
 0x2b4   : > { %v1579_v3 = vpop.f32.mrf.mxu1  ;;  %1856 = vmatmul.mubr.bf16.gmra.mxu0 %v1666_v62 }
 0x2b5   : > { %v1580_v4 = vadd.f32 %v1579_v3, %v2999_v33  ;;  %v1642_v5 = vmax.f32 %v1578_v1, 0.0 }
 0x2b6   : > { %v1583_v6 = vpop.f32.mrf.mxu1 }
 0x2b7   : > { %v1643_v8 = vmax.f32 %v1580_v4, 0.0  ;;  %v1668_v12 = vpack.c.bf16 %v1642_v5, %v1640_v9  ;;  %v1584_v16 = vadd.f32 %v1583_v6, %v3002_v34 }
 0x2b8   : > { %v1585_v10 = vpop.f32.mrf.mxu1 }
 0x2b9   : > { %v1669_v11 = vpack.c.bf16 %v1643_v8, %v1641_v7  ;;  %v1586_v14 = vadd.f32 %v1585_v10, %v2999_v33  ;;  %v1644_v23 = vmax.f32 %v1584_v16, 0.0 }
 0x2ba   : > { %v1587_v13 = vpop.f32.mrf.mxu1 }
 0x2bb   : > { %v1588_v15 = vadd.f32 %v1587_v13, %v3002_v34  ;;  %1863 = vmatprep.mubr.bf16.mxu0 %v1669_v11  ;;  %v1645_v26 = vmax.f32 %v1586_v14, 0.0 }
 0x2bc   : > { %v1589_v17 = vpop.f32.mrf.mxu1  ;;  %1864 = vmatmul.mubr.bf16.gmra.mxu0 %v1668_v12 }
 0x2bd   : > { %v1590_v19 = vadd.f32 %v1589_v17, %v2999_v33  ;;  %v1646_v28 = vmax.f32 %v1588_v15, 0.0 }
 0x2be   : > { %v1593_v20 = vpop.f32.mrf.mxu1 }
 0x2bf   : > { %v1647_v22 = vmax.f32 %v1590_v19, 0.0  ;;  %v1670_v27 = vpack.c.bf16 %v1646_v28, %v1644_v23  ;;  %v1594_v30 = vadd.f32 %v1593_v20, %v3002_v34 }
 0x2c0   : > { %v1595_v24 = vpop.f32.mrf.mxu1 }
 0x2c1   : > { %v1671_v25 = vpack.c.bf16 %v1647_v22, %v1645_v26  ;;  %v1596_v35 = vadd.f32 %v1595_v24, %v2999_v33  ;;  %v1648_v41 = vmax.f32 %v1594_v30, 0.0 }
 0x2c2   : > { %v1597_v36 = vpop.f32.mrf.mxu1 }
 0x2c3   : > { %v1598_v29 = vadd.f32 %v1597_v36, %v3002_v34  ;;  %1871 = vmatprep.mubr.bf16.mxu0 %v1671_v25  ;;  %v1649_v32 = vmax.f32 %v1596_v35, 0.0 }
 0x2c4   : > { %v1599_v31 = vpop.f32.mrf.mxu1  ;;  %1872 = vmatmul.mubr.bf16.gmra.mxu0 %v1670_v27 }
 0x2c5   : > { %v1600_v37 = vadd.f32 %v1599_v31, %v2999_v33  ;;  %v1650_v38 = vmax.f32 %v1598_v29, 0.0 }
 0x2c6   : > { %v1603_v39 = vpop.f32.mrf.mxu1 }
 0x2c7   : > { %v1651_v40 = vmax.f32 %v1600_v37, 0.0  ;;  %v1672_v44 = vpack.c.bf16 %v1650_v38, %v1648_v41  ;;  %v1604_v47 = vadd.f32 %v1603_v39, %v3002_v34 }
 0x2c8   : > { %v1605_v42 = vpop.f32.mrf.mxu1 }
 0x2c9   : > { %v1673_v43 = vpack.c.bf16 %v1651_v40, %v1649_v32  ;;  %v1606_v46 = vadd.f32 %v1605_v42, %v2999_v33  ;;  %v1652_v53 = vmax.f32 %v1604_v47, 0.0 }
 0x2ca   : > { %v1607_v45 = vpop.f32.mrf.mxu1 }
 0x2cb   : > { %v1608_v18 = vadd.f32 %v1607_v45, %v3002_v34  ;;  %1879 = vmatprep.mubr.bf16.mxu1 %v1673_v43  ;;  %v1653_v51 = vmax.f32 %v1606_v46, 0.0 }
 0x2cc   : > { %v1609_v48 = vpop.f32.mrf.mxu1  ;;  %1880 = vmatmul.mubr.bf16.vlgmr.msra.gmra.mxu1 %v1672_v44 }
 0x2cd   : > { %v1610_v21 = vadd.f32 %v1609_v48, %v2999_v33  ;;  %v1654_v49 = vmax.f32 %v1608_v18, 0.0 }
 0x2ce   : > { %v1613_v50 = vpop.f32.mrf.mxu1 }
 0x2cf   : > { %v1655_v52 = vmax.f32 %v1610_v21, 0.0  ;;  %v1674_v56 = vpack.c.bf16 %v1654_v49, %v1652_v53  ;;  %v1614_v60 = vadd.f32 %v1613_v50, %v3002_v34 }
 0x2d0   : > { %v1615_v54 = vpop.f32.mrf.mxu1 }
 0x2d1   : > { %v1675_v55 = vpack.c.bf16 %v1655_v52, %v1653_v51  ;;  %v1616_v58 = vadd.f32 %v1615_v54, %v2999_v33  ;;  %v1656_v3 = vmax.f32 %v1614_v60, 0.0 }
 0x2d2   : > { %v1617_v57 = vpop.f32.mrf.mxu1 }
 0x2d3   : > { %v1618_v59 = vadd.f32 %v1617_v57, %v3002_v34  ;;  %1887 = vmatprep.mubr.bf16.mxu1 %v1675_v55  ;;  %v1657_v1 = vmax.f32 %v1616_v58, 0.0 }
 0x2d4   : > { %v1619_v61 = vpop.f32.mrf.mxu1  ;;  %1888 = vmatmul.mubr.bf16.gmra.mxu1 %v1674_v56 }
 0x2d5   : > { %v1620_v62 = vadd.f32 %v1619_v61, %v2999_v33  ;;  %v1658_v63 = vmax.f32 %v1618_v59, 0.0 }
 0x2d6   : > { %v1623_v0 = vpop.f32.mrf.mxu1 }
 0x2d7   : > { %v1659_v2 = vmax.f32 %v1620_v62, 0.0  ;;  %v1676_v6 = vpack.c.bf16 %v1658_v63, %v1656_v3  ;;  %v1624_v10 = vadd.f32 %v1623_v0, %v3002_v34 }
 0x2d8   : > { %v1625_v4 = vpop.f32.mrf.mxu1 }
 0x2d9   : > { %v1677_v5 = vpack.c.bf16 %v1659_v2, %v1657_v1  ;;  %v1626_v8 = vadd.f32 %v1625_v4, %v2999_v33  ;;  %v1660_v16 = vmax.f32 %v1624_v10, 0.0 }
 0x2da   : > { %v1627_v7 = vpop.f32.mrf.mxu1 }
 0x2db   : > { %v1628_v9 = vadd.f32 %v1627_v7, %v3002_v34  ;;  %1895 = vmatprep.mubr.bf16.mxu1 %v1677_v5  ;;  %v1661_v14 = vmax.f32 %v1626_v8, 0.0  ;;  %v3042_v34 = vld [vmem:[%s3139_s10] ss:$0 sm:$0xff] }
 0x2dc   : > { %v1629_v11 = vpop.f32.mrf.mxu1  ;;  %1896 = vmatmul.mubr.bf16.gmra.mxu1 %v1676_v6 }
 0x2dd   : > { %v1630_v12 = vadd.f32 %v1629_v11, %v2999_v33  ;;  %v1662_v13 = vmax.f32 %v1628_v9, 0.0 }
 0x2df   : > { %v1663_v15 = vmax.f32 %v1630_v12, 0.0  ;;  %v1678_v19 = vpack.c.bf16 %v1662_v13, %v1660_v16 }
 0x2e1   : > { %v1679_v17 = vpack.c.bf16 %v1663_v15, %v1661_v14 }
 0x2e3   : > { %1903 = vmatprep.mubr.bf16.mxu1 %v1679_v17 }
 0x2e4   : > { %1904 = vmatmul.mubr.bf16.gmra.mxu1 %v1678_v19 }
 0x36c   : > { %v2190_v28 = vpop.f32.mrf.mxu0 }
 0x36e   : > { %v2191_v20 = vpop.f32.mrf.mxu0 }
 0x36f   : > { %v2192_v26 = vadd.f32 %v2191_v20, %v2190_v28 }
 0x370   : > { %v2193_v33 = vpop.f32.mrf.mxu0 }
 0x371   : > { %v1850_v22 = vadd.f32 %v2192_v26, %v3042_v34 }
 0x372   : > { %v2194_v23 = vpop.f32.mrf.mxu0 }
 0x373   : > { %1912 = vst [vmem:[%s3045_s15] sm:$0xff] %v1850_v22  ;;  %v2195_v24 = vadd.f32 %v2194_v23, %v2193_v33 }
 0x374   : > { %v2196_v25 = vpop.f32.mrf.mxu0 }
 0x375   : > { %v1853_v27 = vadd.f32 %v2195_v24, %v3042_v34 }
 0x376   : > { %v2197_v36 = vpop.f32.mrf.mxu0 }
 0x377   : > { %1913 = vst [vmem:[%s3045_s15 + $0x8] sm:$0xff] %v1853_v27  ;;  %v2198_v35 = vadd.f32 %v2197_v36, %v2196_v25 }
 0x378   : > { %v2199_v29 = vpop.f32.mrf.mxu0 }
 0x379   : > { %v1858_v30 = vadd.f32 %v2198_v35, %v3042_v34 }
 0x37a   : > { %v2200_v31 = vpop.f32.mrf.mxu0 }
 0x37b   : > { %1914 = vst [vmem:[%s3045_s15 + $0x10] sm:$0xff] %v1858_v30  ;;  %v2201_v37 = vadd.f32 %v2200_v31, %v2199_v29 }
 0x37c   : > { %v2202_v38 = vpop.f32.mrf.mxu0 }
 0x37d   : > { %v1861_v39 = vadd.f32 %v2201_v37, %v3042_v34 }
 0x37e   : > { %v2203_v32 = vpop.f32.mrf.mxu0 }
 0x37f   : > { %1915 = vst [vmem:[%s3045_s15 + $0x18] sm:$0xff] %v1861_v39  ;;  %v2204_v40 = vadd.f32 %v2203_v32, %v2202_v38 }
 0x380   : > { %v2205_v41 = vpop.f32.mrf.mxu0 }
 0x381   : > { %v1866_v42 = vadd.f32 %v2204_v40, %v3042_v34 }
 0x382   : > { %v2206_v43 = vpop.f32.mrf.mxu0 }
 0x383   : > { %1916 = vst [vmem:[%s3045_s15 + $0x20] sm:$0xff] %v1866_v42  ;;  %v2207_v44 = vadd.f32 %v2206_v43, %v2205_v41 }
 0x384   : > { %v2208_v45 = vpop.f32.mrf.mxu0 }
 0x385   : > { %v1869_v46 = vadd.f32 %v2207_v44, %v3042_v34 }
 0x386   : > { %v2209_v18 = vpop.f32.mrf.mxu0 }
 0x387   : > { %1917 = vst [vmem:[%s3045_s15 + $0x28] sm:$0xff] %v1869_v46  ;;  %v2210_v47 = vadd.f32 %v2209_v18, %v2208_v45 }
 0x388   : > { %v2211_v48 = vpop.f32.mrf.mxu0 }
 0x389   : > { %v1874_v21 = vadd.f32 %v2210_v47, %v3042_v34 }
 0x38a   : > { %v2212_v49 = vpop.f32.mrf.mxu0 }
 0x38b   : > { %1918 = vst [vmem:[%s3045_s15 + $0x30] sm:$0xff] %v1874_v21  ;;  %v2213_v50 = vadd.f32 %v2212_v49, %v2211_v48 }
 0x38c   : > { %v2214_v51 = vpop.f32.mrf.mxu1 }
 0x38d   : > { %v1877_v52 = vadd.f32 %v2213_v50, %v3042_v34 }
 0x38e   : > { %v2215_v53 = vpop.f32.mrf.mxu1 }
 0x38f   : > { %1919 = vst [vmem:[%s3045_s15 + $0x38] sm:$0xff] %v1877_v52  ;;  %v2216_v54 = vadd.f32 %v2215_v53, %v2214_v51 }
 0x390   : > { %v2217_v55 = vpop.f32.mrf.mxu1 }
 0x391   : > { %v1882_v56 = vadd.f32 %v2216_v54, %v3042_v34 }
 0x392   : > { %v2218_v57 = vpop.f32.mrf.mxu1 }
 0x393   : > { %1920 = vst [vmem:[%s3045_s15 + $0x40] sm:$0xff] %v1882_v56  ;;  %v2219_v58 = vadd.f32 %v2218_v57, %v2217_v55 }
 0x394   : > { %v2220_v59 = vpop.f32.mrf.mxu1 }
 0x395   : > { %v1885_v60 = vadd.f32 %v2219_v58, %v3042_v34 }
 0x396   : > { %v2221_v61 = vpop.f32.mrf.mxu1 }
 0x397   : > { %1921 = vst [vmem:[%s3045_s15 + $0x48] sm:$0xff] %v1885_v60  ;;  %v2222_v62 = vadd.f32 %v2221_v61, %v2220_v59 }
 0x398   : > { %v2223_v63 = vpop.f32.mrf.mxu1 }
 0x399   : > { %v1890_v0 = vadd.f32 %v2222_v62, %v3042_v34 }
 0x39a   : > { %v2224_v1 = vpop.f32.mrf.mxu1 }
 0x39b   : > { %1922 = vst [vmem:[%s3045_s15 + $0x50] sm:$0xff] %v1890_v0  ;;  %v2225_v2 = vadd.f32 %v2224_v1, %v2223_v63 }
 0x39c   : > { %v2226_v3 = vpop.f32.mrf.mxu1 }
 0x39d   : > { %v1893_v4 = vadd.f32 %v2225_v2, %v3042_v34 }
 0x39e   : > { %v2227_v5 = vpop.f32.mrf.mxu1 }
 0x39f   : > { %1923 = vst [vmem:[%s3045_s15 + $0x58] sm:$0xff] %v1893_v4  ;;  %v2228_v6 = vadd.f32 %v2227_v5, %v2226_v3 }
 0x3a0   : > { %v2229_v7 = vpop.f32.mrf.mxu1 }
 0x3a1   : > { %v1898_v8 = vadd.f32 %v2228_v6, %v3042_v34 }
 0x3a2   : > { %v2230_v9 = vpop.f32.mrf.mxu1 }
 0x3a3   : > { %1924 = vst [vmem:[%s3045_s15 + $0x60] sm:$0xff] %v1898_v8  ;;  %v2231_v10 = vadd.f32 %v2230_v9, %v2229_v7 }
 0x3a4   : > { %v2232_v11 = vpop.f32.mrf.mxu1 }
 0x3a5   : > { %v1901_v12 = vadd.f32 %v2231_v10, %v3042_v34 }
 0x3a6   : > { %v2233_v13 = vpop.f32.mrf.mxu1 }
 0x3a7   : > { %1925 = vst [vmem:[%s3045_s15 + $0x68] sm:$0xff] %v1901_v12  ;;  %v2234_v14 = vadd.f32 %v2233_v13, %v2232_v11 }
 0x3a8   : > { %v2235_v15 = vpop.f32.mrf.mxu1 }
 0x3a9   : > { %v1906_v16 = vadd.f32 %v2234_v14, %v3042_v34 }
 0x3aa   : > { %v2236_v17 = vpop.f32.mrf.mxu1 }
 0x3ab   : > { %1926 = vst [vmem:[%s3045_s15 + $0x70] sm:$0xff] %v1906_v16  ;;  %v2237_v19 = vadd.f32 %v2236_v17, %v2235_v15 }
 0x3ad   : > { %v1909_v28 = vadd.f32 %v2237_v19, %v3042_v34 }
 0x3af   : > { %1927 = vst [vmem:[%s3045_s15 + $0x78] sm:$0xff] %v1909_v28 }
 0x3b0   : > { %2517 = shalt.err (!%p2514_p3)
}
 0x3b1   : > { %s2518_s19 = scalar_lea.hbm %s3081_s25, 2048  ;;  %s2522_s15 = scalar_lea.hbm %s3140_s11, 4096 }
 0x3b2   : > { %p2519_p2 = scmp.ne.s32.totalorder %s3081_s25, %s2518_s19  ;;  %p2523_p6 = scmp.lt.s32.totalorder %s3081_s25, %s3140_s11 }
 0x3b3   : > { %p2524_p9 = scmp.lt.s32.totalorder %s2522_s15, %s2518_s19 }
 0x3b4   : > { %p2520_p4 = pnand %p2519_p2, %p2682_p5 }
 0x3b5   : > { %p2525_p10 = por %p2524_p9, %p2523_p6 }
 0x3b6   : > { %p2521_p13 = pneg %p2520_p4 }
 0x3b8   : > { %p2526_p12 = pnand %p2525_p10, %p2521_p13 }
 0x3ba   : > { %2529 = shalt.err (!%p2526_p12)
}
 0x3bb   : > { %s2582_s29 = smov 128   ;;  %s2583_s21 = smov 8  }
 0x3bc   : > { %2262 = dma.vmem_to_hbm [thread:$0]  (%p2682_p5), %s3083_s24, 2048, %s3081_s25, %s3089_s14, %s2582_s29, %s2582_s29, %s2583_s21  }
 0x3bd PF: > { %p2279_p7 = scmp.ge.s32.totalorder %s2572_s20, 2  ;;  %s1957_s16 = sand.u32 1, %s2560_s17  }
 0x3be   : > { %p3156_p8 = scmp.ne.s32.totalorder %s3149_s28, 0  ;;  %s1958_s12 = scalar_lea.sflag [#allocation4], %s1957_s16 }
 0x3c0   : > { %p2272_p11 = pnand %p2279_p7, %p3156_p8 }
 0x3c2   : > { %p2273_p0 = pneg %p2272_p11 }
 0x3c4   : > { %2555 = dma.done.wait (%p2273_p0), %s1958_s12, 2048  }
 0x3c5   : > { %2557 = vsyncadd (%p2273_p0), %s1958_s12, 4294965248  ;;  %s3157_s20 = sld [smem:[#allocation12_spill]]  ;;  %s3160_s17 = smov %s2564_s18 }
 0x3c6   : > { %s3158_s23 = sld [smem:[#allocation11_spill]] }
 0x3c7   : > { %s3159_s19 = sld [smem:[#allocation13_spill]] }
 0x3cb   : > { %p23_p1 = scmp.ge.s32.totalorder %s3157_s20, 4  }
 0x3cc   : > { %s3161_s18 = smov %s3158_s23 }
 0x3cd   :  { %25 = sbr.rel (!%p23_p1) target bundleno = 5 (0x5), region = 111 }
 0x3d2   :  { %1963 = vsyncpa [#allocation3], 1 }
 0x3d3   :  { %1965 = vsyncpa [#allocation3 + $0x1], 1 }
 0x3d4   :  { %1966 = vsyncpa [#allocation6], 1 }
 0x3d5   :  { %1967 = vsyncpa [#allocation4], 1 }
 0x3d6   :  { %1969 = vsyncpa [#allocation4 + $0x1], 1 }

</bundles_post_ra>
